<compile_context>
chip_gen: v5e
topology: v5e:2x2
jax: 0.10.0
libtpu: 0.0.40
codegen_flags: <defaults>
</compile_context>

<pallas_src>
import jax
import jax.numpy as jnp
from jax.experimental import pallas as pl
from jax.experimental.pallas import tpu as pltpu

# Hidden sizes of the module.
H1, H2, CODE = 512, 128, 2


def ae2d_kernel(x_ref,
                w1_ref, b1_ref,
                w2_ref, b2_ref,
                w3_ref, b3_ref,      # w3: [2,128] f32 (output-major rows), b3: (2,) f32 in SMEM
                w4_ref, b4_ref,      # w4: [2,128] f32, b4: [1,128] f32
                w5_ref, b5_ref,
                w6_ref, b6_ref,
                out_ref):
    """Fused forward: enc(F->512)+relu -> enc(512->128) -> code(128->2)+relu
    -> dec(2->128)+relu -> dec(128->512)+relu -> out(512->F)+relu."""

    def mxu_dense(h, w_ref, b_ref, relu):
        # bf16 x bf16 MXU matmul, f32 accumulation; bias-add / ReLU in f32 (VPU).
        y = jnp.dot(h.astype(jnp.bfloat16), w_ref[...],
                    preferred_element_type=jnp.float32) + b_ref[...]
        return jnp.maximum(y, 0.0) if relu else y

    h = mxu_dense(x_ref[...], w1_ref, b1_ref, relu=True)    # [tm, 512]
    h = mxu_dense(h, w2_ref, b2_ref, relu=False)            # [tm, 128] (no relu, per module)

    # encoder_output_layer (128 -> 2), off the MXU, f32:
    # broadcast-multiply (VPU) + lane reduction (XLU) per output column.
    c0 = jnp.sum(h * w3_ref[0:1, :], axis=-1, keepdims=True) + b3_ref[0]   # [tm, 1]
    c1 = jnp.sum(h * w3_ref[1:2, :], axis=-1, keepdims=True) + b3_ref[1]   # [tm, 1]
    c0 = jnp.maximum(c0, 0.0)
    c1 = jnp.maximum(c1, 0.0)

    # decoder_hidden_layer (2 -> 128) as a 2-term rank-1 VPU update, f32.
    h = jnp.maximum(c0 * w4_ref[0:1, :] + c1 * w4_ref[1:2, :] + b4_ref[...], 0.0)  # [tm, 128]

    h = mxu_dense(h, w5_ref, b5_ref, relu=True)             # [tm, 512]
    h = mxu_dense(h, w6_ref, b6_ref, relu=True)             # [tm, F]
    out_ref[...] = h.astype(out_ref.dtype)


def prepare_kernel_params(params):
    """Derive kernel-ready parameters from the f32 [in, out] weights.

    * Big matmul weights (layers 1, 2, 5, 6) -> bf16 (MXU inputs).
    * The 2-wide bottleneck stays f32:
        - w3 stored output-major, shape [2, 128], so each output column is a
          lane-aligned row for the broadcast-multiply + reduce.
        - b3 flattened to (2,) for SMEM.
        - w4 keeps its [in=2, out=128] layout for the rank-1 update.
    * Biases stay f32 (added after the f32 accumulation).
    """
    kp = {}
    for i in (1, 2, 5, 6):
        kp[f"w{i}"] = params[f"w{i}"].astype(jnp.bfloat16)
        kp[f"b{i}"] = params[f"b{i}"].astype(jnp.float32)
    kp["w3"] = params["w3"].T.astype(jnp.float32)            # [2, 128]
    kp["b3"] = params["b3"].reshape(CODE).astype(jnp.float32)  # (2,) -> SMEM
    kp["w4"] = params["w4"].astype(jnp.float32)               # [2, 128]
    kp["b4"] = params["b4"].astype(jnp.float32)               # [1, 128]
    return kp


def _round_up(n, m):
    return ((n + m - 1) // m) * m


def _choose_tm(B):
    """Batch tile size.

    * B < 256: one grid step (tile = padded batch).
    * B >= 256: at least 2 grid steps (so ("parallel",) can use both v7x
      TensorCores), tiles capped at 512 rows and sized to minimize padding.
    """
    if B < 256:
        return max(8, _round_up(B, 8))
    n_steps = max(2, pl.cdiv(B, 512))
    return _round_up(pl.cdiv(B, n_steps), 8)     # always <= 512, multiple of 8


def ae2d_forward(x, kparams, *, tm=None):
    """x: [B, F] (f32 or bf16 — bf16 recommended).  Output has x's dtype."""
    B, F = x.shape
    if tm is None:
        tm = _choose_tm(B)

    # Pad batch up to a multiple of the tile so the grid divides evenly.
    Bp = _round_up(B, tm)
    if Bp != B:
        x = jnp.pad(x, ((0, Bp - B), (0, 0)))

    def full_spec(arr):
        # Whole weight / bias resident in VMEM for every batch tile; constant
        # index_map -> single-buffer (saves VMEM + re-fetch bookkeeping).
        zeros = (0,) * arr.ndim
        try:
            return pl.BlockSpec(arr.shape, lambda i: zeros,
                                pipeline_mode=pl.Buffered(1))
        except (AttributeError, TypeError):
            return pl.BlockSpec(arr.shape, lambda i: zeros)

    names = ("w1", "b1", "w2", "b2", "w3", "b3",
             "w4", "b4", "w5", "b5", "w6", "b6")
    operands = tuple(kparams[n] for n in names)
    param_specs = []
    for name, arr in zip(names, operands):
        if name == "b3":
            # Two f32 scalars: keep them in SMEM, read as scalars in-kernel.
            param_specs.append(pl.BlockSpec(memory_space=pltpu.MemorySpace.SMEM))
        else:
            param_specs.append(full_spec(arr))

    grid_spec = pltpu.PrefetchScalarGridSpec(
        num_scalar_prefetch=0,
        grid=(Bp // tm,),
        in_specs=[pl.BlockSpec((tm, F), lambda i: (i, 0))] + param_specs,
        out_specs=pl.BlockSpec((tm, F), lambda i: (i, 0)),
    )

    # Advisory cost estimate (un-padded FLOPs).
    flops = 2 * Bp * (F * H1 + H1 * H2 + H2 * CODE + CODE * H2 + H2 * H1 + H1 * F)
    weight_bytes = sum(int(a.size) * a.dtype.itemsize for a in operands)
    act_bytes = 2 * Bp * F * x.dtype.itemsize          # x in + out (same dtype)
    cost = pl.CostEstimate(flops=flops, transcendentals=0,
                           bytes_accessed=weight_bytes + act_bytes)

    out = pl.pallas_call(
        ae2d_kernel,
        out_shape=jax.ShapeDtypeStruct((Bp, F), x.dtype),
        grid_spec=grid_spec,
        compiler_params=pltpu.CompilerParams(
            dimension_semantics=("parallel",),
            # Above v5e's 16 MiB default, safely below v7x's 64 MiB physical.
            vmem_limit_bytes=32 * 1024 * 1024),
        cost_estimate=cost,
    )(x, *operands)

    return out[:B] if Bp != B else out


def init_params(key, input_shape):
    """Deterministic init mimicking nn.Linear's U(-1/sqrt(fan_in), +1/sqrt(fan_in)).

    Weights stored pre-transposed as [in, out]; biases as [1, out].  These are
    the "true" f32 parameters used by the reference; kernel params are derived
    via prepare_kernel_params (bf16 cast for the big layers, f32 bottleneck).
    """
    dims = [(input_shape, H1), (H1, H2), (H2, CODE),
            (CODE, H2), (H2, H1), (H1, input_shape)]
    params = {}
    keys = jax.random.split(key, 2 * len(dims))
    for idx, (fan_in, fan_out) in enumerate(dims):
        bound = 1.0 / jnp.sqrt(jnp.float32(fan_in))
        wk, bk = keys[2 * idx], keys[2 * idx + 1]
        params[f"w{idx + 1}"] = jax.random.uniform(
            wk, (fan_in, fan_out), jnp.float32, -bound, bound)
        params[f"b{idx + 1}"] = jax.random.uniform(
            bk, (1, fan_out), jnp.float32, -bound, bound)
    return params


def ae2d_reference(x, p):
    """Pure-f32 reference matching the PyTorch forward exactly."""
    relu = lambda v: jnp.maximum(v, 0.0)
    h = relu(x @ p["w1"] + p["b1"])
    h = h @ p["w2"] + p["b2"]                    # no relu (matches the module)
    code = relu(h @ p["w3"] + p["b3"])
    h = relu(code @ p["w4"] + p["b4"])
    h = relu(h @ p["w5"] + p["b5"])
    return relu(h @ p["w6"] + p["b6"])


if __name__ == "__main__":
    key = jax.random.PRNGKey(0)
    kx, kp = jax.random.split(key)

    input_shape = 256   # flattened feature size (kwargs['input_shape'])
    batch = 16

    x_f32 = jax.random.normal(kx, (batch, input_shape), jnp.float32)
    params = init_params(kp, input_shape)
    kparams = prepare_kernel_params(params)

    # bf16 activations end-to-end (caller supplies bf16; halves HBM traffic).
    x = x_f32.astype(jnp.bfloat16)
    out = ae2d_forward(x, kparams)
    out = jax.block_until_ready(out)

    ref = ae2d_reference(x_f32, params)
    assert out.shape == (batch, input_shape)
    assert out.dtype == jnp.bfloat16
    out_f32 = out.astype(jnp.float32)
    max_err = float(jnp.max(jnp.abs(out_f32 - ref)))
    # bf16 I/O + bf16 MXU inputs (f32 accumulation) vs pure-f32 reference.
    assert jnp.allclose(out_f32, ref, atol=6e-2, rtol=6e-2), (
        f"mismatch vs reference, max abs err = {max_err}")

    print("KERNEL_OK")
</pallas_src>

<mosaic_0001>
module attributes {stable_mosaic.version = 11 : i64} {
  func.func @ae2d_kernel(%arg0: i32, %arg1: memref<16x256xbf16, #tpu.memory_space<vmem>>, %arg2: memref<256x512xbf16, #tpu.memory_space<vmem>>, %arg3: memref<1x512xf32, #tpu.memory_space<vmem>>, %arg4: memref<512x128xbf16, #tpu.memory_space<vmem>>, %arg5: memref<1x128xf32, #tpu.memory_space<vmem>>, %arg6: memref<2x128xf32, #tpu.memory_space<vmem>>, %arg7: memref<2xf32, #tpu.memory_space<smem>>, %arg8: memref<2x128xf32, #tpu.memory_space<vmem>>, %arg9: memref<1x128xf32, #tpu.memory_space<vmem>>, %arg10: memref<128x512xbf16, #tpu.memory_space<vmem>>, %arg11: memref<1x512xf32, #tpu.memory_space<vmem>>, %arg12: memref<512x256xbf16, #tpu.memory_space<vmem>>, %arg13: memref<1x256xf32, #tpu.memory_space<vmem>>, %arg14: memref<16x256xbf16, #tpu.memory_space<vmem>>) attributes {dimension_semantics = [#tpu.dimension_semantics<parallel>], iteration_bounds = array<i64: 1>, scalar_prefetch = 0 : i64, scratch_operands = 0 : i64, tpu.core_type = #tpu.core_type<tc>, window_params = [{transform_indices = @transform_0, window_bounds = array<i64: 16, 256>}, {pipeline_mode = #tpu.pipeline_mode<synchronous>, transform_indices = @transform_1, window_bounds = array<i64: 256, 512>}, {pipeline_mode = #tpu.pipeline_mode<synchronous>, transform_indices = @transform_2, window_bounds = array<i64: 1, 512>}, {pipeline_mode = #tpu.pipeline_mode<synchronous>, transform_indices = @transform_3, window_bounds = array<i64: 512, 128>}, {pipeline_mode = #tpu.pipeline_mode<synchronous>, transform_indices = @transform_4, window_bounds = array<i64: 1, 128>}, {pipeline_mode = #tpu.pipeline_mode<synchronous>, transform_indices = @transform_5, window_bounds = array<i64: 2, 128>}, {transform_indices = @transform_6, window_bounds = array<i64: 2>}, {pipeline_mode = #tpu.pipeline_mode<synchronous>, transform_indices = @transform_7, window_bounds = array<i64: 2, 128>}, {pipeline_mode = #tpu.pipeline_mode<synchronous>, transform_indices = @transform_8, window_bounds = array<i64: 1, 128>}, {pipeline_mode = #tpu.pipeline_mode<synchronous>, transform_indices = @transform_9, window_bounds = array<i64: 128, 512>}, {pipeline_mode = #tpu.pipeline_mode<synchronous>, transform_indices = @transform_10, window_bounds = array<i64: 1, 512>}, {pipeline_mode = #tpu.pipeline_mode<synchronous>, transform_indices = @transform_11, window_bounds = array<i64: 512, 256>}, {pipeline_mode = #tpu.pipeline_mode<synchronous>, transform_indices = @transform_12, window_bounds = array<i64: 1, 256>}, {transform_indices = @transform_13, window_bounds = array<i64: 16, 256>}]} {
    %c0 = arith.constant 0 : index
    %c0_0 = arith.constant 0 : index
    %0 = vector.load %arg1[%c0, %c0_0] : memref<16x256xbf16, #tpu.memory_space<vmem>>, vector<16x256xbf16>
    %c0_1 = arith.constant 0 : index
    %c0_2 = arith.constant 0 : index
    %1 = vector.load %arg2[%c0_1, %c0_2] : memref<256x512xbf16, #tpu.memory_space<vmem>>, vector<256x512xbf16>
    %cst = arith.constant dense<0.000000e+00> : vector<16x512xf32>
    %2 = tpu.matmul %0, %1, %cst {dimension_numbers = #tpu.dot_dimension_numbers<[1], [0], [0], [1], [0, 0, 1, 1], [], []>} : vector<16x256xbf16>, vector<256x512xbf16>, vector<16x512xf32> -> vector<16x512xf32>
    %c0_3 = arith.constant 0 : index
    %c0_4 = arith.constant 0 : index
    %3 = vector.load %arg3[%c0_3, %c0_4] : memref<1x512xf32, #tpu.memory_space<vmem>>, vector<1x512xf32>
    %4 = vector.broadcast %3 : vector<1x512xf32> to vector<16x512xf32>
    %5 = arith.addf %2, %4 : vector<16x512xf32>
    %cst_5 = arith.constant 0.000000e+00 : f32
    %6 = vector.broadcast %cst_5 : f32 to vector<16x512xf32>
    %7 = arith.maximumf %5, %6 : vector<16x512xf32>
    %8 = arith.truncf %7 : vector<16x512xf32> to vector<16x512xbf16>
    %c0_6 = arith.constant 0 : index
    %c0_7 = arith.constant 0 : index
    %9 = vector.load %arg4[%c0_6, %c0_7] : memref<512x128xbf16, #tpu.memory_space<vmem>>, vector<512x128xbf16>
    %cst_8 = arith.constant dense<0.000000e+00> : vector<16x128xf32>
    %10 = tpu.matmul %8, %9, %cst_8 {dimension_numbers = #tpu.dot_dimension_numbers<[1], [0], [0], [1], [0, 0, 1, 1], [], []>} : vector<16x512xbf16>, vector<512x128xbf16>, vector<16x128xf32> -> vector<16x128xf32>
    %c0_9 = arith.constant 0 : index
    %c0_10 = arith.constant 0 : index
    %11 = vector.load %arg5[%c0_9, %c0_10] : memref<1x128xf32, #tpu.memory_space<vmem>>, vector<1x128xf32>
    %12 = vector.broadcast %11 : vector<1x128xf32> to vector<16x128xf32>
    %13 = arith.addf %10, %12 : vector<16x128xf32>
    %c0_11 = arith.constant 0 : index
    %c0_12 = arith.constant 0 : index
    %14 = vector.load %arg6[%c0_11, %c0_12] : memref<2x128xf32, #tpu.memory_space<vmem>>, vector<1x128xf32>
    %15 = vector.broadcast %14 : vector<1x128xf32> to vector<16x128xf32>
    %16 = arith.mulf %13, %15 : vector<16x128xf32>
    %cst_13 = arith.constant dense<0.000000e+00> : vector<16xf32>
    %17 = vector.multi_reduction <add>, %16, %cst_13 [1] : vector<16x128xf32> to vector<16xf32>
    %18 = vector.shape_cast %17 : vector<16xf32> to vector<16x1xf32>
    %c0_14 = arith.constant 0 : index
    %19 = memref.load %arg7[%c0_14] : memref<2xf32, #tpu.memory_space<smem>>
    %20 = vector.broadcast %19 : f32 to vector<16x1xf32>
    %21 = arith.addf %18, %20 : vector<16x1xf32>
    %c1 = arith.constant 1 : index
    %c0_15 = arith.constant 0 : index
    %22 = vector.load %arg6[%c1, %c0_15] : memref<2x128xf32, #tpu.memory_space<vmem>>, vector<1x128xf32>
    %23 = vector.broadcast %22 : vector<1x128xf32> to vector<16x128xf32>
    %24 = arith.mulf %13, %23 : vector<16x128xf32>
    %cst_16 = arith.constant dense<0.000000e+00> : vector<16xf32>
    %25 = vector.multi_reduction <add>, %24, %cst_16 [1] : vector<16x128xf32> to vector<16xf32>
    %26 = vector.shape_cast %25 : vector<16xf32> to vector<16x1xf32>
    %c1_17 = arith.constant 1 : index
    %27 = memref.load %arg7[%c1_17] : memref<2xf32, #tpu.memory_space<smem>>
    %28 = vector.broadcast %27 : f32 to vector<16x1xf32>
    %29 = arith.addf %26, %28 : vector<16x1xf32>
    %cst_18 = arith.constant 0.000000e+00 : f32
    %30 = vector.broadcast %cst_18 : f32 to vector<16x1xf32>
    %31 = arith.maximumf %21, %30 : vector<16x1xf32>
    %cst_19 = arith.constant 0.000000e+00 : f32
    %32 = vector.broadcast %cst_19 : f32 to vector<16x1xf32>
    %33 = arith.maximumf %29, %32 : vector<16x1xf32>
    %c0_20 = arith.constant 0 : index
    %c0_21 = arith.constant 0 : index
    %34 = vector.load %arg8[%c0_20, %c0_21] : memref<2x128xf32, #tpu.memory_space<vmem>>, vector<1x128xf32>
    %35 = vector.broadcast %31 : vector<16x1xf32> to vector<16x128xf32>
    %36 = vector.broadcast %34 : vector<1x128xf32> to vector<16x128xf32>
    %37 = arith.mulf %35, %36 : vector<16x128xf32>
    %c1_22 = arith.constant 1 : index
    %c0_23 = arith.constant 0 : index
    %38 = vector.load %arg8[%c1_22, %c0_23] : memref<2x128xf32, #tpu.memory_space<vmem>>, vector<1x128xf32>
    %39 = vector.broadcast %33 : vector<16x1xf32> to vector<16x128xf32>
    %40 = vector.broadcast %38 : vector<1x128xf32> to vector<16x128xf32>
    %41 = arith.mulf %39, %40 : vector<16x128xf32>
    %42 = arith.addf %37, %41 : vector<16x128xf32>
    %c0_24 = arith.constant 0 : index
    %c0_25 = arith.constant 0 : index
    %43 = vector.load %arg9[%c0_24, %c0_25] : memref<1x128xf32, #tpu.memory_space<vmem>>, vector<1x128xf32>
    %44 = vector.broadcast %43 : vector<1x128xf32> to vector<16x128xf32>
    %45 = arith.addf %42, %44 : vector<16x128xf32>
    %cst_26 = arith.constant 0.000000e+00 : f32
    %46 = vector.broadcast %cst_26 : f32 to vector<16x128xf32>
    %47 = arith.maximumf %45, %46 : vector<16x128xf32>
    %48 = arith.truncf %47 : vector<16x128xf32> to vector<16x128xbf16>
    %c0_27 = arith.constant 0 : index
    %c0_28 = arith.constant 0 : index
    %49 = vector.load %arg10[%c0_27, %c0_28] : memref<128x512xbf16, #tpu.memory_space<vmem>>, vector<128x512xbf16>
    %cst_29 = arith.constant dense<0.000000e+00> : vector<16x512xf32>
    %50 = tpu.matmul %48, %49, %cst_29 {dimension_numbers = #tpu.dot_dimension_numbers<[1], [0], [0], [1], [0, 0, 1, 1], [], []>} : vector<16x128xbf16>, vector<128x512xbf16>, vector<16x512xf32> -> vector<16x512xf32>
    %c0_30 = arith.constant 0 : index
    %c0_31 = arith.constant 0 : index
    %51 = vector.load %arg11[%c0_30, %c0_31] : memref<1x512xf32, #tpu.memory_space<vmem>>, vector<1x512xf32>
    %52 = vector.broadcast %51 : vector<1x512xf32> to vector<16x512xf32>
    %53 = arith.addf %50, %52 : vector<16x512xf32>
    %cst_32 = arith.constant 0.000000e+00 : f32
    %54 = vector.broadcast %cst_32 : f32 to vector<16x512xf32>
    %55 = arith.maximumf %53, %54 : vector<16x512xf32>
    %56 = arith.truncf %55 : vector<16x512xf32> to vector<16x512xbf16>
    %c0_33 = arith.constant 0 : index
    %c0_34 = arith.constant 0 : index
    %57 = vector.load %arg12[%c0_33, %c0_34] : memref<512x256xbf16, #tpu.memory_space<vmem>>, vector<512x256xbf16>
    %cst_35 = arith.constant dense<0.000000e+00> : vector<16x256xf32>
    %58 = tpu.matmul %56, %57, %cst_35 {dimension_numbers = #tpu.dot_dimension_numbers<[1], [0], [0], [1], [0, 0, 1, 1], [], []>} : vector<16x512xbf16>, vector<512x256xbf16>, vector<16x256xf32> -> vector<16x256xf32>
    %c0_36 = arith.constant 0 : index
    %c0_37 = arith.constant 0 : index
    %59 = vector.load %arg13[%c0_36, %c0_37] : memref<1x256xf32, #tpu.memory_space<vmem>>, vector<1x256xf32>
    %60 = vector.broadcast %59 : vector<1x256xf32> to vector<16x256xf32>
    %61 = arith.addf %58, %60 : vector<16x256xf32>
    %cst_38 = arith.constant 0.000000e+00 : f32
    %62 = vector.broadcast %cst_38 : f32 to vector<16x256xf32>
    %63 = arith.maximumf %61, %62 : vector<16x256xf32>
    %64 = arith.truncf %63 : vector<16x256xf32> to vector<16x256xbf16>
    %c0_39 = arith.constant 0 : index
    %c0_40 = arith.constant 0 : index
    %65 = vector.load %arg14[%c0_39, %c0_40] : memref<16x256xbf16, #tpu.memory_space<vmem>>, vector<16x256xbf16>
    tpu.vector_store %arg14[%c0_39, %c0_40], %64 {strides = array<i32>} : memref<16x256xbf16, #tpu.memory_space<vmem>>, vector<16x256xbf16>,
    return
  }
  func.func @transform_0(%arg0: i32) -> (i32, i32) {
    %c0_i32 = arith.constant 0 : i32
    %c0_i32_0 = arith.constant 0 : i32
    return %arg0, %c0_i32 : i32, i32
  }
  func.func @transform_1(%arg0: i32) -> (i32, i32) {
    %c0_i32 = arith.constant 0 : i32
    %c0_i32_0 = arith.constant 0 : i32
    %c0_i32_1 = arith.constant 0 : i32
    return %c0_i32, %c0_i32_0 : i32, i32
  }
  func.func @transform_2(%arg0: i32) -> (i32, i32) {
    %c0_i32 = arith.constant 0 : i32
    %c0_i32_0 = arith.constant 0 : i32
    %c0_i32_1 = arith.constant 0 : i32
    return %c0_i32, %c0_i32_0 : i32, i32
  }
  func.func @transform_3(%arg0: i32) -> (i32, i32) {
    %c0_i32 = arith.constant 0 : i32
    %c0_i32_0 = arith.constant 0 : i32
    %c0_i32_1 = arith.constant 0 : i32
    return %c0_i32, %c0_i32_0 : i32, i32
  }
  func.func @transform_4(%arg0: i32) -> (i32, i32) {
    %c0_i32 = arith.constant 0 : i32
    %c0_i32_0 = arith.constant 0 : i32
    %c0_i32_1 = arith.constant 0 : i32
    return %c0_i32, %c0_i32_0 : i32, i32
  }
  func.func @transform_5(%arg0: i32) -> (i32, i32) {
    %c0_i32 = arith.constant 0 : i32
    %c0_i32_0 = arith.constant 0 : i32
    %c0_i32_1 = arith.constant 0 : i32
    return %c0_i32, %c0_i32_0 : i32, i32
  }
  func.func @transform_6(%arg0: i32) -> i32 {
    %c0_i32 = arith.constant 0 : i32
    %c0_i32_0 = arith.constant 0 : i32
    return %c0_i32 : i32
  }
  func.func @transform_7(%arg0: i32) -> (i32, i32) {
    %c0_i32 = arith.constant 0 : i32
    %c0_i32_0 = arith.constant 0 : i32
    %c0_i32_1 = arith.constant 0 : i32
    return %c0_i32, %c0_i32_0 : i32, i32
  }
  func.func @transform_8(%arg0: i32) -> (i32, i32) {
    %c0_i32 = arith.constant 0 : i32
    %c0_i32_0 = arith.constant 0 : i32
    %c0_i32_1 = arith.constant 0 : i32
    return %c0_i32, %c0_i32_0 : i32, i32
  }
  func.func @transform_9(%arg0: i32) -> (i32, i32) {
    %c0_i32 = arith.constant 0 : i32
    %c0_i32_0 = arith.constant 0 : i32
    %c0_i32_1 = arith.constant 0 : i32
    return %c0_i32, %c0_i32_0 : i32, i32
  }
  func.func @transform_10(%arg0: i32) -> (i32, i32) {
    %c0_i32 = arith.constant 0 : i32
    %c0_i32_0 = arith.constant 0 : i32
    %c0_i32_1 = arith.constant 0 : i32
    return %c0_i32, %c0_i32_0 : i32, i32
  }
  func.func @transform_11(%arg0: i32) -> (i32, i32) {
    %c0_i32 = arith.constant 0 : i32
    %c0_i32_0 = arith.constant 0 : i32
    %c0_i32_1 = arith.constant 0 : i32
    return %c0_i32, %c0_i32_0 : i32, i32
  }
  func.func @transform_12(%arg0: i32) -> (i32, i32) {
    %c0_i32 = arith.constant 0 : i32
    %c0_i32_0 = arith.constant 0 : i32
    %c0_i32_1 = arith.constant 0 : i32
    return %c0_i32, %c0_i32_0 : i32, i32
  }
  func.func @transform_13(%arg0: i32) -> (i32, i32) {
    %c0_i32 = arith.constant 0 : i32
    %c0_i32_0 = arith.constant 0 : i32
    return %arg0, %c0_i32 : i32, i32
  }
}

</mosaic_0001>

<bundles_post_ra>
// kernel: tpu_custom_call.1
= control target key start
LH: loop header
LB: loop body
LE: loop exit
PB: predicated region body
PF: predicated region fallthrough
CT: control target
= control target key end

     0   :  { %18 = vsyncpa [#allocation3], 0  ;;  %s3312_s0 = inlined_call_operand.hbm [shape: bf16[16,256], index: 0, kind: input, shape index: {}]   ;;  %s3313_s1 = inlined_call_operand.hbm [shape: bf16[256,512], index: 1, kind: input, shape index: {}]   ;;  %s3314_s2 = inlined_call_operand.hbm [shape: f32[1,512], index: 2, kind: input, shape index: {}]   ;;  %s3315_s3 = inlined_call_operand.hbm [shape: bf16[512,128], index: 3, kind: input, shape index: {}]   ;;  %s3316_s4 = inlined_call_operand.hbm [shape: f32[1,128], index: 4, kind: input, shape index: {}]   ;;  %s3317_s5 = inlined_call_operand.vmem [shape: f32[2,128], index: 5, kind: input, shape index: {}]   ;;  %s3318_s6 = inlined_call_operand.hbm [shape: f32[2], index: 6, kind: input, shape index: {}]   ;;  %s3319_s7 = inlined_call_operand.hbm [shape: f32[2,128], index: 7, kind: input, shape index: {}]   ;;  %s3320_s8 = inlined_call_operand.hbm [shape: f32[1,128], index: 8, kind: input, shape index: {}]   ;;  %s3321_s9 = inlined_call_operand.hbm [shape: bf16[128,512], index: 9, kind: input, shape index: {}]   ;;  %s3322_s10 = inlined_call_operand.vmem [shape: f32[1,512], index: 10, kind: input, shape index: {}]   ;;  %s3323_s11 = inlined_call_operand.hbm [shape: bf16[512,256], index: 11, kind: input, shape index: {}]   ;;  %s3324_s12 = inlined_call_operand.vmem [shape: f32[1,256], index: 12, kind: input, shape index: {}]   ;;  %s3325_s13 = inlined_call_operand.hbm [shape: bf16[16,256], index: 13, kind: output, shape index: {}]  }
   0x1   :  { %19 = vsyncpa [#allocation7], 0 }
   0x2   :  { %20 = vsyncpa [#allocation10], 0 }
   0x3   :  { %21 = vsyncpa [#allocation5], 0 }
   0x4   :  { %22 = vsyncpa [#allocation14], 0 }
   0x5   :  { %23 = vsyncpa [#allocation17], 0  ;;  %s42_s27 = sshll.u32 %s3313_s1, 4  ;;  %s43_s27 = int_to_ptr.hbm [resolvable:$true] %s42_s27 }
   0x6   :  { %24 = vsyncpa [#allocation4], 0  ;;  %s3147_s28 = smov [#allocation6]   ;;  %s66_s15 = sshll.u32 %s3315_s3, 4  ;;  %s67_s15 = int_to_ptr.hbm [resolvable:$true] %s66_s15 }
   0x7   :  { %s44_s29 = sshll.u32 %s3147_s28, 4  ;;  %s3148_s16 = smov 256   ;;  %s45_s29 = int_to_ptr.vmem [resolvable:$true] %s44_s29 }
   0x8   :  { %s3149_s17 = smov 16   ;;  %s3150_s18 = smov [#allocation9]  }
   0x9   :  { %50 = dma.hbm_to_vmem [thread:$0]  %s43_s27, 8192, %s45_s29, [#allocation7], %s3148_s16, %s3148_s16, %s3149_s17  }
   0xa   :  { %s68_s19 = sshll.u32 %s3150_s18, 4  ;;  %s3151_s20 = smov 64   ;;  %s69_s19 = int_to_ptr.vmem [resolvable:$true] %s68_s19 }
   0xb   :  { %s3152_s21 = smov 4   ;;  %s102_s23 = sshll.u32 %s3319_s7, 4  ;;  %s103_s23 = int_to_ptr.hbm [resolvable:$true] %s102_s23 }
   0xc   :  { %74 = dma.hbm_to_vmem [thread:$0]  %s67_s15, 4096, %s69_s19, [#allocation10], %s3151_s20, %s3151_s20, %s3152_s21  }
   0xd   :  { %s3153_s24 = smov [#allocation13]   ;;  %s123_s28 = sshll.u32 %s3321_s9, 4  ;;  %s124_s28 = int_to_ptr.hbm [resolvable:$true] %s123_s28 }
   0xe   :  { %s104_s25 = sshll.u32 %s3153_s24, 4  ;;  %s3154_s27 = smov [#allocation16]   ;;  %s105_s25 = int_to_ptr.vmem [resolvable:$true] %s104_s25 }
   0xf   :  { %107 = dma.hbm_to_vmem [thread:$0]  %s103_s23, 32, %s105_s25, [#allocation14]  }
  0x10   :  { %s125_s29 = sshll.u32 %s3154_s27, 4  ;;  %s29_s15 = sshll.u32 %s3312_s0, 4  ;;  %s126_s29 = int_to_ptr.vmem [resolvable:$true] %s125_s29  ;;  %s30_s15 = int_to_ptr.hbm [resolvable:$true] %s29_s15 }
  0x11   :  { %131 = dma.hbm_to_vmem [thread:$0]  %s124_s28, 4096, %s126_s29, [#allocation17], %s3148_s16, %s3148_s16, %s3149_s17  }
  0x12   :  { %s3155_s7 = smov [#allocation2]   ;;  %s56_s21 = sshll.u32 %s3314_s2, 4  ;;  %s57_s21 = int_to_ptr.hbm [resolvable:$true] %s56_s21 }
  0x13   :  { %s31_s18 = sshll.u32 %s3155_s7, 4  ;;  %s3156_s1 = smov 128   ;;  %s32_s18 = int_to_ptr.vmem [resolvable:$true] %s31_s18 }
  0x14   :  { %s3157_s9 = smov 8   ;;  %s3158_s22 = smov [#allocation8]  }
  0x15   :  { %37 = dma.hbm_to_vmem [thread:$0]  %s30_s15, 256, %s32_s18, [#allocation3], %s3156_s1, %s3156_s1, %s3157_s9  }
  0x16   :  { %s58_s23 = sshll.u32 %s3158_s22, 4  ;;  %s80_s16 = sshll.u32 %s3316_s4, 4  ;;  %s59_s23 = int_to_ptr.vmem [resolvable:$true] %s58_s23  ;;  %s81_s16 = int_to_ptr.hbm [resolvable:$true] %s80_s16 }
  0x17   :  { %61 = dma.hbm_to_vmem [thread:$0]  %s57_s21, 64, %s59_s23, [#allocation7]  }
  0x18   :  { %s93_s2 = sshll.u32 %s3318_s6, 4  ;;  %s3159_s26 = smov [#allocation11]   ;;  %s94_s2 = int_to_ptr.hbm [resolvable:$true] %s93_s2 }
  0x19   :  { %s82_s3 = sshll.u32 %s3159_s26, 4  ;;  %s3160_s28 = smov [#allocation12]   ;;  %s83_s3 = int_to_ptr.vmem [resolvable:$true] %s82_s3 }
  0x1a   :  { %85 = dma.hbm_to_vmem [thread:$0]  %s81_s16, 16, %s83_s3, [#allocation10]  }
  0x1b   :  { %96 = dma.hbm_to_smem %s94_s2, 16, %s3160_s28, [#allocation5]  }
  0x1c   :  { %s113_s30 = sshll.u32 %s3320_s8, 4  ;;  %s3161_s4 = smov [#allocation15]   ;;  %s114_s30 = int_to_ptr.hbm [resolvable:$true] %s113_s30 }
  0x1d   :  { %s115_s14 = sshll.u32 %s3161_s4, 4  ;;  %s138_s18 = sshll.u32 %s3323_s11, 4  ;;  %s116_s14 = int_to_ptr.vmem [resolvable:$true] %s115_s14  ;;  %s139_s18 = int_to_ptr.hbm [resolvable:$true] %s138_s18 }
  0x1e   :  { %118 = dma.hbm_to_vmem [thread:$0]  %s114_s30, 16, %s116_s14, [#allocation14]  }
  0x1f   :  { %s3162_s6 = smov [#allocation18]  }
  0x20   :  { %s140_s19 = sshll.u32 %s3162_s6, 4  ;;  %s141_s19 = int_to_ptr.vmem [resolvable:$true] %s140_s19 }
  0x21   :  { %146 = dma.hbm_to_vmem [thread:$0]  %s139_s18, 8192, %s141_s19, [#allocation17], %s3156_s1, %s3156_s1, %s3157_s9  }
  0x22   :  { %3133 = dma.done.wait [#allocation3], 256  }
  0x23   :  { %3134 = vsyncadd [#allocation3], 4294967040 }
  0x24   :  { %3135 = dma.done.wait [#allocation7], 8256  }
  0x25   :  { %3136 = vsyncadd [#allocation7], 4294959040 }
  0x26   :  { %3137 = dma.done.wait [#allocation10], 4112  }
  0x27   :  { %3138 = vsyncadd [#allocation10], 4294963184 }
  0x28   :  { %3139 = dma.done.wait [#allocation5], 16  }
  0x29   :  { %3140 = vsyncadd [#allocation5], 4294967280 }
  0x2a   :  { %3141 = dma.done.wait [#allocation14], 48  }
  0x2b   :  { %3142 = vsyncadd [#allocation14], 4294967248 }
  0x2c   :  { %3143 = dma.done.wait [#allocation17], 12288  }
  0x2d   :  { %3144 = vsyncadd [#allocation17], 4294955008 }
  0x2e   :  { %189 = sfence }
  0x2f   :  { %v2009_v0 = vld [vmem:[#allocation6 + $0xe0] sm:$0xf]  ;;  %v2696_v1 = vld [vmem:[#allocation6 + $0xec] sm:$0xf0]  ;;  %v2694_v5 = vld [vmem:[#allocation6 + $0xe4] sm:$0xf] }
  0x30   :  { %v2137_v2 = vld [vmem:[#allocation6 + $0x1e0] sm:$0xf]  ;;  %v2010_v3 = vor.u32 %v2696_v1, %v2009_v0  ;;  %v2728_v4 = vld [vmem:[#allocation6 + $0x1ec] sm:$0xf0]  ;;  %v2011_v6 = vld [vmem:[#allocation6 + $0xf0] sm:$0xf0] }
  0x31   :  { %v2138_v7 = vor.u32 %v2728_v4, %v2137_v2  ;;  %v2014_v8 = vor.u32 %v2694_v5, %v2011_v6  ;;  %v2726_v9 = vld [vmem:[#allocation6 + $0x1e4] sm:$0xf]  ;;  %v2139_v10 = vld [vmem:[#allocation6 + $0x1f0] sm:$0xf0]  ;;  %v1993_v11 = vld [vmem:[#allocation6 + $0xc0] sm:$0xf] }
  0x32   :  { %596 = vmatpush.bf16.msra.mxu0 %v2010_v3  ;;  %v2142_v12 = vor.u32 %v2726_v9, %v2139_v10  ;;  %v2692_v13 = vld [vmem:[#allocation6 + $0xcc] sm:$0xf0]  ;;  %v2121_v14 = vld [vmem:[#allocation6 + $0x1c0] sm:$0xf]  ;;  %v2690_v18 = vld [vmem:[#allocation6 + $0xc4] sm:$0xf] }
  0x33   :  { %v2724_v15 = vld [vmem:[#allocation6 + $0x1cc] sm:$0xf0]  ;;  %610 = vmatpush.bf16.msra.mxu1 %v2138_v7  ;;  %624 = vmatpush.bf16.msra.mxu2 %v2014_v8  ;;  %v1994_v16 = vor.u32 %v2692_v13, %v1993_v11  ;;  %v1995_v19 = vld [vmem:[#allocation6 + $0xd0] sm:$0xf0]  ;;  %v2722_v20 = vld [vmem:[#allocation6 + $0x1c4] sm:$0xf] }
  0x34   :  { %v2122_v17 = vor.u32 %v2724_v15, %v2121_v14  ;;  %638 = vmatpush.bf16.msra.mxu3 %v2142_v12  ;;  %v1998_v21 = vor.u32 %v2690_v18, %v1995_v19  ;;  %v2123_v22 = vld [vmem:[#allocation6 + $0x1d0] sm:$0xf0]  ;;  %v1977_v23 = vld [vmem:[#allocation6 + $0xa0] sm:$0xf]  ;;  %v2688_v24 = vld [vmem:[#allocation6 + $0xac] sm:$0xf0] }
  0x35   :  { %v2126_v25 = vor.u32 %v2722_v20, %v2123_v22  ;;  %v2105_v26 = vld [vmem:[#allocation6 + $0x1a0] sm:$0xf]  ;;  %v2720_v27 = vld [vmem:[#allocation6 + $0x1ac] sm:$0xf0]  ;;  %v2686_v28 = vld [vmem:[#allocation6 + $0xa4] sm:$0xf]  ;;  %v1978_v29 = vor.u32 %v2688_v24, %v1977_v23 }
  0x36   :  { %597 = vmatpush.bf16.msra.mxu0 %v1994_v16  ;;  %v1979_v30 = vld [vmem:[#allocation6 + $0xb0] sm:$0xf0]  ;;  %v2718_v31 = vld [vmem:[#allocation6 + $0x1a4] sm:$0xf]  ;;  %v2106_v33 = vor.u32 %v2720_v27, %v2105_v26  ;;  %v1961_v35 = vld [vmem:[#allocation6 + $0x80] sm:$0xf] }
  0x37   :  { %v2107_v32 = vld [vmem:[#allocation6 + $0x1b0] sm:$0xf0]  ;;  %611 = vmatpush.bf16.msra.mxu1 %v2122_v17  ;;  %625 = vmatpush.bf16.msra.mxu2 %v1998_v21  ;;  %v1982_v34 = vor.u32 %v2686_v28, %v1979_v30  ;;  %v2684_v36 = vld [vmem:[#allocation6 + $0x8c] sm:$0xf0]  ;;  %v2089_v37 = vld [vmem:[#allocation6 + $0x180] sm:$0xf] }
  0x38   :  { %639 = vmatpush.bf16.msra.mxu3 %v2126_v25  ;;  %v2110_v38 = vor.u32 %v2718_v31, %v2107_v32  ;;  %v2716_v39 = vld [vmem:[#allocation6 + $0x18c] sm:$0xf0]  ;;  %v2682_v40 = vld [vmem:[#allocation6 + $0x84] sm:$0xf]  ;;  %v1963_v41 = vld [vmem:[#allocation6 + $0x90] sm:$0xf0]  ;;  %v1962_v44 = vor.u32 %v2684_v36, %v1961_v35 }
  0x39   :  { %v2714_v42 = vld [vmem:[#allocation6 + $0x184] sm:$0xf]  ;;  %v2091_v43 = vld [vmem:[#allocation6 + $0x190] sm:$0xf0]  ;;  %v2090_v45 = vor.u32 %v2716_v39, %v2089_v37  ;;  %v1966_v46 = vor.u32 %v2682_v40, %v1963_v41  ;;  %v1945_v47 = vld [vmem:[#allocation6 + $0x60] sm:$0xf] }
  0x3a   :  { %598 = vmatpush.bf16.msra.mxu0 %v1978_v29  ;;  %v2680_v48 = vld [vmem:[#allocation6 + $0x6c] sm:$0xf0]  ;;  %v2073_v49 = vld [vmem:[#allocation6 + $0x160] sm:$0xf]  ;;  %v2094_v50 = vor.u32 %v2714_v42, %v2091_v43  ;;  %v2678_v52 = vld [vmem:[#allocation6 + $0x64] sm:$0xf] }
  0x3b   :  { %612 = vmatpush.bf16.msra.mxu1 %v2106_v33  ;;  %626 = vmatpush.bf16.msra.mxu2 %v1982_v34  ;;  %v2712_v51 = vld [vmem:[#allocation6 + $0x16c] sm:$0xf0]  ;;  %v1947_v53 = vld [vmem:[#allocation6 + $0x70] sm:$0xf0]  ;;  %v2710_v54 = vld [vmem:[#allocation6 + $0x164] sm:$0xf]  ;;  %v1946_v56 = vor.u32 %v2680_v48, %v1945_v47 }
  0x3c   :  { %640 = vmatpush.bf16.msra.mxu3 %v2110_v38  ;;  %v2075_v55 = vld [vmem:[#allocation6 + $0x170] sm:$0xf0]  ;;  %v2074_v57 = vor.u32 %v2712_v51, %v2073_v49  ;;  %v1950_v58 = vor.u32 %v2678_v52, %v1947_v53  ;;  %v1929_v59 = vld [vmem:[#allocation6 + $0x40] sm:$0xf]  ;;  %v2676_v60 = vld [vmem:[#allocation6 + $0x4c] sm:$0xf0] }
  0x3d   :  { %v2057_v61 = vld [vmem:[#allocation6 + $0x140] sm:$0xf]  ;;  %v2078_v62 = vor.u32 %v2710_v54, %v2075_v55  ;;  %v2708_v63 = vld [vmem:[#allocation6 + $0x14c] sm:$0xf0]  ;;  %v2674_v0 = vld [vmem:[#allocation6 + $0x44] sm:$0xf]  ;;  %v1930_v4 = vor.u32 %v2676_v60, %v1929_v59 }
  0x3e   :  { %599 = vmatpush.bf16.msra.mxu0 %v1962_v44  ;;  %v1931_v1 = vld [vmem:[#allocation6 + $0x50] sm:$0xf0]  ;;  %v2706_v2 = vld [vmem:[#allocation6 + $0x144] sm:$0xf]  ;;  %v2058_v5 = vor.u32 %v2708_v63, %v2057_v61  ;;  %v1913_v7 = vld [vmem:[#allocation6 + $0x20] sm:$0xf] }
  0x3f   :  { %613 = vmatpush.bf16.msra.mxu1 %v2090_v45  ;;  %627 = vmatpush.bf16.msra.mxu2 %v1966_v46  ;;  %v2059_v3 = vld [vmem:[#allocation6 + $0x150] sm:$0xf0]  ;;  %v1934_v6 = vor.u32 %v2674_v0, %v1931_v1  ;;  %v2672_v8 = vld [vmem:[#allocation6 + $0x2c] sm:$0xf0]  ;;  %v2041_v9 = vld [vmem:[#allocation6 + $0x120] sm:$0xf] }
  0x40   :  { %641 = vmatpush.bf16.msra.mxu3 %v2094_v50  ;;  %v2062_v10 = vor.u32 %v2706_v2, %v2059_v3  ;;  %v2704_v11 = vld [vmem:[#allocation6 + $0x12c] sm:$0xf0]  ;;  %v2670_v12 = vld [vmem:[#allocation6 + $0x24] sm:$0xf]  ;;  %v1915_v13 = vld [vmem:[#allocation6 + $0x30] sm:$0xf0]  ;;  %v1914_v16 = vor.u32 %v2672_v8, %v1913_v7 }
  0x41   :  { %v2702_v14 = vld [vmem:[#allocation6 + $0x124] sm:$0xf]  ;;  %v2043_v15 = vld [vmem:[#allocation6 + $0x130] sm:$0xf0]  ;;  %v1897_v17 = vld [vmem:[#allocation6] sm:$0xf]  ;;  %v2042_v20 = vor.u32 %v2704_v11, %v2041_v9  ;;  %v1918_v21 = vor.u32 %v2670_v12, %v1915_v13 }
  0x42   :  { %600 = vmatpush.bf16.msra.mxu0 %v1946_v56  ;;  %v2668_v18 = vld [vmem:[#allocation6 + $0xc] sm:$0xf0]  ;;  %v2025_v19 = vld [vmem:[#allocation6 + $0x100] sm:$0xf]  ;;  %v2666_v23 = vld [vmem:[#allocation6 + $0x4] sm:$0xf]  ;;  %v2046_v25 = vor.u32 %v2702_v14, %v2043_v15 }
  0x43   :  { %614 = vmatpush.bf16.msra.mxu1 %v2074_v57  ;;  %628 = vmatpush.bf16.msra.mxu2 %v1950_v58  ;;  %v2700_v22 = vld [vmem:[#allocation6 + $0x10c] sm:$0xf0]  ;;  %v1899_v24 = vld [vmem:[#allocation6 + $0x10] sm:$0xf0]  ;;  %v2698_v26 = vld [vmem:[#allocation6 + $0x104] sm:$0xf]  ;;  %v1898_v32 = vor.u32 %v2668_v18, %v1897_v17 }
  0x44   :  { %642 = vmatpush.bf16.msra.mxu3 %v2078_v62  ;;  %v2027_v27 = vld [vmem:[#allocation6 + $0x110] sm:$0xf0]  ;;  %v2017_v28 = vld [vmem:[#allocation6 + $0xe8] sm:$0xf]  ;;  %v2697_v29 = vld [vmem:[#allocation6 + $0xf4] sm:$0xf0]  ;;  %v2026_v36 = vor.u32 %v2700_v22, %v2025_v19  ;;  %v1902_v37 = vor.u32 %v2666_v23, %v1899_v24 }
  0x45   :  { %v2145_v30 = vld [vmem:[#allocation6 + $0x1e8] sm:$0xf]  ;;  %v2729_v31 = vld [vmem:[#allocation6 + $0x1f4] sm:$0xf0]  ;;  %v2695_v33 = vld [vmem:[#allocation6 + $0xec] sm:$0xf]  ;;  %v2030_v41 = vor.u32 %v2698_v26, %v2027_v27  ;;  %v2018_v42 = vor.u32 %v2697_v29, %v2017_v28 }
  0x46   :  { %601 = vmatpush.bf16.msra.mxu0 %v1930_v4  ;;  %v2019_v34 = vld [vmem:[#allocation6 + $0xf8] sm:$0xf0]  ;;  %v2727_v35 = vld [vmem:[#allocation6 + $0x1ec] sm:$0xf]  ;;  %v1889_v39 = vld [vmem:[#allocation2] sm:$0xf]  ;;  %v2146_v45 = vor.u32 %v2729_v31, %v2145_v30 }
  0x47   :  { %615 = vmatpush.bf16.msra.mxu1 %v2058_v5  ;;  %629 = vmatpush.bf16.msra.mxu2 %v1934_v6  ;;  %v2147_v38 = vld [vmem:[#allocation6 + $0x1f8] sm:$0xf0]  ;;  %v2665_v40 = vld [vmem:[#allocation2 + $0x4] sm:$0xf0]  ;;  %v2664_v43 = vld [vmem:[#allocation2 + $0x4] sm:$0xf]  ;;  %v2022_v46 = vor.u32 %v2695_v33, %v2019_v34 }
  0x48   :  { %643 = vmatpush.bf16.msra.mxu3 %v2062_v10  ;;  %v1891_v44 = vld [vmem:[#allocation2 + $0x8] sm:$0xf0]  ;;  %v2001_v47 = vld [vmem:[#allocation6 + $0xc8] sm:$0xf]  ;;  %v2693_v48 = vld [vmem:[#allocation6 + $0xd4] sm:$0xf0]  ;;  %v2150_v50 = vor.u32 %v2727_v35, %v2147_v38  ;;  %v3270_v51 = vor.u32 %v2665_v40, %v1889_v39 }
  0x49   :  { %v2129_v49 = vld [vmem:[#allocation6 + $0x1c8] sm:$0xf]  ;;  %v2725_v52 = vld [vmem:[#allocation6 + $0x1d4] sm:$0xf0]  ;;  %v2691_v53 = vld [vmem:[#allocation6 + $0xcc] sm:$0xf]  ;;  %v3272_v55 = vor.u32 %v2664_v43, %v1891_v44  ;;  %v2002_v58 = vor.u32 %v2693_v48, %v2001_v47 }
  0x4a   :  { %602 = vmatpush.bf16.msra.mxu0 %v1914_v16  ;;  %v2003_v54 = vld [vmem:[#allocation6 + $0xd8] sm:$0xf0]  ;;  %v2723_v56 = vld [vmem:[#allocation6 + $0x1cc] sm:$0xf]  ;;  %v2130_v59 = vor.u32 %v2725_v52, %v2129_v49  ;;  %v1985_v61 = vld [vmem:[#allocation6 + $0xa8] sm:$0xf] }
  0x4b   :  { %616 = vmatpush.bf16.msra.mxu1 %v2042_v20  ;;  %630 = vmatpush.bf16.msra.mxu2 %v1918_v21  ;;  %v2131_v57 = vld [vmem:[#allocation6 + $0x1d8] sm:$0xf0]  ;;  %v2006_v60 = vor.u32 %v2691_v53, %v2003_v54  ;;  %v2689_v62 = vld [vmem:[#allocation6 + $0xb4] sm:$0xf0]  ;;  %v2113_v63 = vld [vmem:[#allocation6 + $0x1a8] sm:$0xf] }
  0x4c   :  { %644 = vmatpush.bf16.msra.mxu3 %v2046_v25  ;;  %v2134_v0 = vor.u32 %v2723_v56, %v2131_v57  ;;  %v2721_v1 = vld [vmem:[#allocation6 + $0x1b4] sm:$0xf0]  ;;  %v2687_v2 = vld [vmem:[#allocation6 + $0xac] sm:$0xf]  ;;  %v1987_v3 = vld [vmem:[#allocation6 + $0xb8] sm:$0xf0]  ;;  %v1986_v6 = vor.u32 %v2689_v62, %v1985_v61 }
  0x4d   :  { %v2719_v4 = vld [vmem:[#allocation6 + $0x1ac] sm:$0xf]  ;;  %v2115_v5 = vld [vmem:[#allocation6 + $0x1b8] sm:$0xf0]  ;;  %v2114_v7 = vor.u32 %v2721_v1, %v2113_v63  ;;  %v1990_v8 = vor.u32 %v2687_v2, %v1987_v3  ;;  %v1969_v9 = vld [vmem:[#allocation6 + $0x88] sm:$0xf] }
  0x4e   :  { %603 = vmatpush.bf16.msra.mxu0 %v1898_v32  ;;  %v2685_v10 = vld [vmem:[#allocation6 + $0x94] sm:$0xf0]  ;;  %v2097_v11 = vld [vmem:[#allocation6 + $0x188] sm:$0xf]  ;;  %v2118_v12 = vor.u32 %v2719_v4, %v2115_v5  ;;  %v2683_v14 = vld [vmem:[#allocation6 + $0x8c] sm:$0xf] }
  0x4f   :  { %617 = vmatpush.bf16.msra.mxu1 %v2026_v36  ;;  %631 = vmatpush.bf16.msra.mxu2 %v1902_v37  ;;  %v2717_v13 = vld [vmem:[#allocation6 + $0x194] sm:$0xf0]  ;;  %v1971_v15 = vld [vmem:[#allocation6 + $0x98] sm:$0xf0]  ;;  %v2715_v16 = vld [vmem:[#allocation6 + $0x18c] sm:$0xf]  ;;  %v1970_v18 = vor.u32 %v2685_v10, %v1969_v9 }
  0x50   :  { %645 = vmatpush.bf16.msra.mxu3 %v2030_v41  ;;  %v2099_v17 = vld [vmem:[#allocation6 + $0x198] sm:$0xf0]  ;;  %v1953_v19 = vld [vmem:[#allocation6 + $0x68] sm:$0xf]  ;;  %v2098_v20 = vor.u32 %v2717_v13, %v2097_v11  ;;  %v1974_v21 = vor.u32 %v2683_v14, %v1971_v15  ;;  %v2681_v22 = vld [vmem:[#allocation6 + $0x74] sm:$0xf0] }
  0x51   :  { %604 = vmatmul.bf16.vlgmr.msra.gmra.mxu0 %v3270_v51  ;;  %v2081_v23 = vld [vmem:[#allocation6 + $0x168] sm:$0xf]  ;;  %v2713_v24 = vld [vmem:[#allocation6 + $0x174] sm:$0xf0]  ;;  %v2102_v25 = vor.u32 %v2715_v16, %v2099_v17  ;;  %v2679_v26 = vld [vmem:[#allocation6 + $0x6c] sm:$0xf]  ;;  %v1954_v32 = vor.u32 %v2681_v22, %v1953_v19 }
  0x52   :  { %652 = vmatpush.bf16.msrb.mxu0 %v2018_v42  ;;  %632 = vmatmul.bf16.vlgmr.msra.gmra.mxu2 %v3270_v51  ;;  %v1955_v27 = vld [vmem:[#allocation6 + $0x78] sm:$0xf0]  ;;  %v2711_v28 = vld [vmem:[#allocation6 + $0x16c] sm:$0xf]  ;;  %v1937_v30 = vld [vmem:[#allocation6 + $0x48] sm:$0xf]  ;;  %v2082_v36 = vor.u32 %v2713_v24, %v2081_v23 }
  0x53   :  { %666 = vmatpush.bf16.msrb.mxu1 %v2146_v45  ;;  %680 = vmatpush.bf16.msrb.mxu2 %v2022_v46  ;;  %v2083_v29 = vld [vmem:[#allocation6 + $0x178] sm:$0xf0]  ;;  %v2677_v31 = vld [vmem:[#allocation6 + $0x54] sm:$0xf0]  ;;  %v2065_v33 = vld [vmem:[#allocation6 + $0x148] sm:$0xf]  ;;  %v1958_v37 = vor.u32 %v2679_v26, %v1955_v27 }
  0x54   :  { %694 = vmatpush.bf16.msrb.mxu3 %v2150_v50  ;;  %618 = vmatmul.bf16.vlgmr.msra.gmra.mxu1 %v3272_v55  ;;  %v2709_v34 = vld [vmem:[#allocation6 + $0x154] sm:$0xf0]  ;;  %v2675_v35 = vld [vmem:[#allocation6 + $0x4c] sm:$0xf]  ;;  %v1939_v38 = vld [vmem:[#allocation6 + $0x58] sm:$0xf0]  ;;  %v2086_v40 = vor.u32 %v2711_v28, %v2083_v29  ;;  %v1938_v42 = vor.u32 %v2677_v31, %v1937_v30 }
  0x55   :  { %646 = vmatmul.bf16.vlgmr.msra.gmra.mxu3 %v3272_v55  ;;  %v2707_v39 = vld [vmem:[#allocation6 + $0x14c] sm:$0xf]  ;;  %v2067_v41 = vld [vmem:[#allocation6 + $0x158] sm:$0xf0]  ;;  %v2066_v43 = vor.u32 %v2709_v34, %v2065_v33  ;;  %v1942_v44 = vor.u32 %v2675_v35, %v1939_v38  ;;  %v1921_v45 = vld [vmem:[#allocation6 + $0x28] sm:$0xf] }
  0x56   :  { %653 = vmatpush.bf16.msrb.mxu0 %v2002_v58  ;;  %v2673_v46 = vld [vmem:[#allocation6 + $0x34] sm:$0xf0]  ;;  %v2049_v47 = vld [vmem:[#allocation6 + $0x128] sm:$0xf]  ;;  %v2070_v48 = vor.u32 %v2707_v39, %v2067_v41  ;;  %v2671_v50 = vld [vmem:[#allocation6 + $0x2c] sm:$0xf] }
  0x57   :  { %667 = vmatpush.bf16.msrb.mxu1 %v2130_v59  ;;  %681 = vmatpush.bf16.msrb.mxu2 %v2006_v60  ;;  %v2705_v49 = vld [vmem:[#allocation6 + $0x134] sm:$0xf0]  ;;  %v1923_v52 = vld [vmem:[#allocation6 + $0x38] sm:$0xf0]  ;;  %v2703_v53 = vld [vmem:[#allocation6 + $0x12c] sm:$0xf]  ;;  %v1922_v56 = vor.u32 %v2673_v46, %v1921_v45 }
  0x58   :  { %695 = vmatpush.bf16.msrb.mxu3 %v2134_v0  ;;  %v2051_v54 = vld [vmem:[#allocation6 + $0x138] sm:$0xf0]  ;;  %v2050_v57 = vor.u32 %v2705_v49, %v2049_v47  ;;  %v1926_v58 = vor.u32 %v2671_v50, %v1923_v52  ;;  %v1905_v59 = vld [vmem:[#allocation6 + $0x8] sm:$0xf]  ;;  %v2669_v60 = vld [vmem:[#allocation6 + $0x14] sm:$0xf0] }
  0x59   :  { %v2033_v61 = vld [vmem:[#allocation6 + $0x108] sm:$0xf]  ;;  %v2054_v62 = vor.u32 %v2703_v53, %v2051_v54  ;;  %v2701_v63 = vld [vmem:[#allocation6 + $0x114] sm:$0xf0]  ;;  %v2667_v0 = vld [vmem:[#allocation6 + $0xc] sm:$0xf]  ;;  %v1906_v4 = vor.u32 %v2669_v60, %v1905_v59 }
  0x5a   :  { %654 = vmatpush.bf16.msrb.mxu0 %v1986_v6  ;;  %v1907_v1 = vld [vmem:[#allocation6 + $0x18] sm:$0xf0]  ;;  %v2699_v2 = vld [vmem:[#allocation6 + $0x10c] sm:$0xf]  ;;  %v2034_v5 = vor.u32 %v2701_v63, %v2033_v61  ;;  %v2736_v10 = vld [vmem:[#allocation9 + $0x30] sm:$0xff]  ;;  %s3296_s22 = sld [smem:[#allocation12]] }
  0x5b   :  { %668 = vmatpush.bf16.msrb.mxu1 %v2114_v7  ;;  %682 = vmatpush.bf16.msrb.mxu2 %v1990_v8  ;;  %v2035_v3 = vld [vmem:[#allocation6 + $0x118] sm:$0xf0]  ;;  %v1910_v6 = vor.u32 %v2667_v0, %v1907_v1  ;;  %v2744_v11 = vld [vmem:[#allocation9 + $0x70] sm:$0xff]  ;;  %v2743_v13 = vld [vmem:[#allocation9 + $0x68] sm:$0xff]  ;;  %s1869_s2 = sshll.u32 %s3325_s13, 4  ;;  %s1870_s2 = int_to_ptr.hbm [resolvable:$true] %s1869_s2 }
  0x5c   :  { %696 = vmatpush.bf16.msrb.mxu3 %v2118_v12  ;;  %v2038_v7 = vor.u32 %v2699_v2, %v2035_v3  ;;  %v2737_v8 = vld [vmem:[#allocation9 + $0x38] sm:$0xff]  ;;  %v2735_v12 = vld [vmem:[#allocation9 + $0x28] sm:$0xff]  ;;  %v2734_v14 = vld [vmem:[#allocation9 + $0x20] sm:$0xff] }
  0x5d   :  { %v2745_v9 = vld [vmem:[#allocation9 + $0x78] sm:$0xff]  ;;  %v2742_v16 = vld [vmem:[#allocation9 + $0x60] sm:$0xff]  ;;  %v2732_v17 = vld [vmem:[#allocation9 + $0x10] sm:$0xff] }
  0x5e   :  { %655 = vmatpush.bf16.msrb.mxu0 %v1970_v18  ;;  %v2733_v15 = vld [vmem:[#allocation9 + $0x18] sm:$0xff]  ;;  %v2731_v19 = vld [vmem:[#allocation9 + $0x8] sm:$0xff]  ;;  %v2752_v22 = vld [vmem:[#allocation9 + $0xb0] sm:$0xff] }
  0x5f   :  { %669 = vmatpush.bf16.msrb.mxu1 %v2098_v20  ;;  %683 = vmatpush.bf16.msrb.mxu2 %v1974_v21  ;;  %v2741_v18 = vld [vmem:[#allocation9 + $0x58] sm:$0xff]  ;;  %v2739_v21 = vld [vmem:[#allocation9 + $0x48] sm:$0xff]  ;;  %v2738_v23 = vld [vmem:[#allocation9 + $0x40] sm:$0xff] }
  0x60   :  { %697 = vmatpush.bf16.msrb.mxu3 %v2102_v25  ;;  %v2753_v20 = vld [vmem:[#allocation9 + $0xb8] sm:$0xff]  ;;  %v2751_v25 = vld [vmem:[#allocation9 + $0xa8] sm:$0xff]  ;;  %v2760_v26 = vld [vmem:[#allocation9 + $0xf0] sm:$0xff] }
  0x61   :  { %v2761_v24 = vld [vmem:[#allocation9 + $0xf8] sm:$0xff]  ;;  %v2750_v27 = vld [vmem:[#allocation9 + $0xa0] sm:$0xff]  ;;  %v2759_v29 = vld [vmem:[#allocation9 + $0xe8] sm:$0xff] }
  0x62   :  { %656 = vmatpush.bf16.msrb.mxu0 %v1954_v32  ;;  %v3282_v28 = vld [vmem:[#allocation8] sm:$0xf]  ;;  %v2758_v33 = vld [vmem:[#allocation9 + $0xe0] sm:$0xff]  ;;  %v2748_v35 = vld [vmem:[#allocation9 + $0x90] sm:$0xff] }
  0x63   :  { %670 = vmatpush.bf16.msrb.mxu1 %v2082_v36  ;;  %684 = vmatpush.bf16.msrb.mxu2 %v1958_v37  ;;  %v2749_v30 = vld [vmem:[#allocation9 + $0x98] sm:$0xff]  ;;  %v258_v31 = vperm.slane %v3282_v28, 0  ;;  %v259_v37 = vperm.slane %v3282_v28, 1  ;;  %v2747_v41 = vld [vmem:[#allocation9 + $0x88] sm:$0xff]  ;;  %v2756_v45 = vld [vmem:[#allocation9 + $0xd0] sm:$0xff]  ;;  %v260_v2 = vperm.slane %v3282_v28, 2 }
  0x64   :  { %698 = vmatpush.bf16.msrb.mxu3 %v2086_v40  ;;  %v2757_v38 = vld [vmem:[#allocation9 + $0xd8] sm:$0xff]  ;;  %v2755_v53 = vld [vmem:[#allocation9 + $0xc8] sm:$0xff] }
  0x66   :  { %657 = vmatpush.bf16.msrb.mxu0 %v1938_v42 }
  0x67   :  { %671 = vmatpush.bf16.msrb.mxu1 %v2066_v43  ;;  %685 = vmatpush.bf16.msrb.mxu2 %v1942_v44 }
  0x68   :  { %699 = vmatpush.bf16.msrb.mxu3 %v2070_v48  ;;  %v2746_v48 = vld [vmem:[#allocation9 + $0x80] sm:$0xff] }
  0x6a   :  { %658 = vmatpush.bf16.msrb.mxu0 %v1922_v56 }
  0x6b   :  { %672 = vmatpush.bf16.msrb.mxu1 %v2050_v57  ;;  %686 = vmatpush.bf16.msrb.mxu2 %v1926_v58 }
  0x6c   :  { %700 = vmatpush.bf16.msrb.mxu3 %v2054_v62  ;;  %v2754_v62 = vld [vmem:[#allocation9 + $0xc0] sm:$0xff] }
  0x6e   :  { %659 = vmatpush.bf16.msrb.mxu0 %v1906_v4 }
  0x6f   :  { %673 = vmatpush.bf16.msrb.mxu1 %v2034_v5  ;;  %687 = vmatpush.bf16.msrb.mxu2 %v1910_v6  ;;  %v261_v6 = vperm.slane %v3282_v28, 3  ;;  %v2402_v28 = vld [vmem:[#allocation16 + $0xe8] sm:$0xf] }
  0x70   :  { %701 = vmatpush.bf16.msrb.mxu3 %v2038_v7 }
  0x71   :  { %660 = vmatmul.bf16.vlgmr.msrb.gmra.mxu0 %v3270_v51 }
  0x72   :  { %980 = vmatpush.bf16.msra.mxu0 %v2737_v8  ;;  %674 = vmatmul.bf16.vlgmr.msrb.gmra.mxu1 %v3272_v55 }
  0x73   :  { %994 = vmatpush.bf16.msra.mxu1 %v2745_v9  ;;  %688 = vmatmul.bf16.vlgmr.msrb.gmra.mxu2 %v3270_v51  ;;  %v2740_v51 = vld [vmem:[#allocation9 + $0x50] sm:$0xff] }
  0x74   :  { %702 = vmatmul.bf16.vlgmr.msrb.gmra.mxu3 %v3272_v55  ;;  %v2730_v55 = vld [vmem:[#allocation9] sm:$0xff]  ;;  %1008 = vmatpush.bf16.msra.mxu2 %v2753_v20 }
  0x75   :  { %1022 = vmatpush.bf16.msra.mxu3 %v2761_v24  ;;  %v2792_v24 = vld [vmem:[#allocation16 + $0xec] sm:$0xf0] }
  0x76   :  { %981 = vmatpush.bf16.msra.mxu0 %v2736_v10 }
  0x77   :  { %995 = vmatpush.bf16.msra.mxu1 %v2744_v11 }
  0x78   :  { %1009 = vmatpush.bf16.msra.mxu2 %v2752_v22 }
  0x79   :  { %1023 = vmatpush.bf16.msra.mxu3 %v2760_v26 }
  0x7a   :  { %982 = vmatpush.bf16.msra.mxu0 %v2735_v12 }
  0x7b   :  { %996 = vmatpush.bf16.msra.mxu1 %v2743_v13 }
  0x7c   :  { %1010 = vmatpush.bf16.msra.mxu2 %v2751_v25  ;;  %v2790_v25 = vld [vmem:[#allocation16 + $0xe4] sm:$0xf] }
  0x7d   :  { %1024 = vmatpush.bf16.msra.mxu3 %v2759_v29  ;;  %v2793_v29 = vld [vmem:[#allocation16 + $0xf4] sm:$0xf0] }
  0x7e   :  { %983 = vmatpush.bf16.msra.mxu0 %v2734_v14 }
  0x7f   :  { %997 = vmatpush.bf16.msra.mxu1 %v2742_v16 }
  0x80   :  { %1011 = vmatpush.bf16.msra.mxu2 %v2750_v27  ;;  %v2396_v27 = vld [vmem:[#allocation16 + $0xf0] sm:$0xf0] }
  0x81   :  { %1025 = vmatpush.bf16.msra.mxu3 %v2758_v33  ;;  %v2404_v33 = vld [vmem:[#allocation16 + $0xf8] sm:$0xf0] }
  0x82   :  { %984 = vmatpush.bf16.msra.mxu0 %v2733_v15 }
  0x83   :  { %998 = vmatpush.bf16.msra.mxu1 %v2741_v18 }
  0x84   :  { %1012 = vmatpush.bf16.msra.mxu2 %v2749_v30  ;;  %v2399_v30 = vor.u32 %v2790_v25, %v2396_v27  ;;  %v2779_v27 = vld [vmem:[#allocation16 + $0x8c] sm:$0xf] }
  0x85   :  { %1026 = vmatpush.bf16.msra.mxu3 %v2757_v38  ;;  %v2380_v38 = vld [vmem:[#allocation16 + $0xd0] sm:$0xf0] }
  0x86   :  { %985 = vmatpush.bf16.msra.mxu0 %v2732_v17 }
  0x87   :  { %999 = vmatpush.bf16.msra.mxu1 %v2740_v51 }
  0x88   :  { %1013 = vmatpush.bf16.msra.mxu2 %v2748_v35 }
  0x89   :  { %1027 = vmatpush.bf16.msra.mxu3 %v2756_v45  ;;  %v2388_v45 = vld [vmem:[#allocation16 + $0xd8] sm:$0xf0] }
  0x8a   :  { %986 = vmatpush.bf16.msra.mxu0 %v2731_v19 }
  0x8b   :  { %1000 = vmatpush.bf16.msra.mxu1 %v2739_v21 }
  0x8c   :  { %1014 = vmatpush.bf16.msra.mxu2 %v2747_v41  ;;  %v2386_v41 = vld [vmem:[#allocation16 + $0xc8] sm:$0xf] }
  0x8d   :  { %1028 = vmatpush.bf16.msra.mxu3 %v2755_v53 }
  0x8e   :  { %987 = vmatpush.bf16.msra.mxu0 %v2730_v55 }
  0x8f   :  { %1001 = vmatpush.bf16.msra.mxu1 %v2738_v23  ;;  %v2394_v23 = vld [vmem:[#allocation16 + $0xe0] sm:$0xf] }
  0x90   :  { %1015 = vmatpush.bf16.msra.mxu2 %v2746_v48  ;;  %v2395_v26 = vor.u32 %v2792_v24, %v2394_v23  ;;  %v2354_v23 = vld [vmem:[#allocation16 + $0x88] sm:$0xf]  ;;  %v2781_v24 = vld [vmem:[#allocation16 + $0x94] sm:$0xf0] }
  0x91   :  { %1029 = vmatpush.bf16.msra.mxu3 %v2754_v62 }
  0x92   :  { %1285 = vmatpush.bf16.msrb.mxu0 %v2395_v26  ;;  %v2355_v26 = vor.u32 %v2781_v24, %v2354_v23  ;;  %v2823_v23 = vld [vmem:[#allocation18 + $0xe4] sm:$0xf0]  ;;  %v2594_v24 = vld [vmem:[#allocation18 + $0x170] sm:$0xf] }
  0x93   :  { %1299 = vmatpush.bf16.msrb.mxu1 %v2399_v30  ;;  %v2330_v30 = vld [vmem:[#allocation16 + $0x60] sm:$0xf] }
  0xce   :  { %v605_v32 = vpop.f32.mrf.mxu0 }
  0xcf   :  { %v606_v36 = vadd.f32 %v605_v32, %v258_v31  ;;  %v2791_v32 = vld [vmem:[#allocation16 + $0xec] sm:$0xf] }
  0xd0   :  { %v2407_v35 = vor.u32 %v2791_v32, %v2404_v33  ;;  %v2774_v32 = vld [vmem:[#allocation16 + $0x64] sm:$0xf] }
  0xd1   :  { %v619_v34 = vpop.f32.mrf.mxu1 }
  0xd2   :  { %v620_v42 = vadd.f32 %v619_v34, %v606_v36  ;;  %v2378_v34 = vld [vmem:[#allocation16 + $0xc0] sm:$0xf]  ;;  %v2788_v36 = vld [vmem:[#allocation16 + $0xcc] sm:$0xf0]  ;;  %1327 = vmatpush.bf16.msrb.mxu3 %v2407_v35  ;;  %v2338_v35 = vld [vmem:[#allocation16 + $0x68] sm:$0xf] }
  0xd4   :  { %v708_v49 = vmax.f32 %v620_v42, 0.0  ;;  %v2789_v42 = vld [vmem:[#allocation16 + $0xd4] sm:$0xf0] }
  0xd5   :  { %v633_v39 = vpop.f32.mrf.mxu2 }
  0xd6   :  { %v634_v43 = vadd.f32 %v633_v39, %v259_v37  ;;  %v607_v44 = vpop.f32.mrf.mxu0  ;;  %v2379_v39 = vor.u32 %v2788_v36, %v2378_v34  ;;  %v2332_v34 = vld [vmem:[#allocation16 + $0x70] sm:$0xf0]  ;;  %v2777_v36 = vld [vmem:[#allocation16 + $0x74] sm:$0xf0] }
  0xd7   :  { %v608_v46 = vadd.f32 %v607_v44, %v258_v31  ;;  %v2403_v31 = vor.u32 %v2793_v29, %v2402_v28  ;;  %v2387_v44 = vor.u32 %v2789_v42, %v2386_v41  ;;  %v2356_v28 = vld [vmem:[#allocation16 + $0x98] sm:$0xf0]  ;;  %v2314_v42 = vld [vmem:[#allocation16 + $0x40] sm:$0xf] }
  0xd8   :  { %v647_v40 = vpop.f32.mrf.mxu3  ;;  %1286 = vmatpush.bf16.msrb.mxu0 %v2379_v39  ;;  %v2359_v29 = vor.u32 %v2779_v27, %v2356_v28  ;;  %v2775_v39 = vld [vmem:[#allocation16 + $0x6c] sm:$0xf]  ;;  %v2658_v27 = vld [vmem:[#allocation18 + $0x1f0] sm:$0xf]  ;;  %v2857_v28 = vld [vmem:[#allocation18 + $0x1f4] sm:$0xf0] }
  0xd9   :  { %v621_v47 = vpop.f32.mrf.mxu1  ;;  %v648_v52 = vadd.f32 %v647_v40, %v634_v43  ;;  %1313 = vmatpush.bf16.msrb.mxu2 %v2403_v31  ;;  %v2787_v43 = vld [vmem:[#allocation16 + $0xcc] sm:$0xf]  ;;  %v2776_v31 = vld [vmem:[#allocation16 + $0x6c] sm:$0xf0] }
  0xda   :  { %v622_v50 = vadd.f32 %v621_v47, %v608_v46  ;;  %v2362_v46 = vld [vmem:[#allocation16 + $0xa0] sm:$0xf]  ;;  %v2784_v47 = vld [vmem:[#allocation16 + $0xac] sm:$0xf0]  ;;  %v2391_v48 = vor.u32 %v2787_v43, %v2388_v45  ;;  %v2331_v33 = vor.u32 %v2776_v31, %v2330_v30  ;;  %v2659_v31 = vor.u32 %v2857_v28, %v2658_v27  ;;  %v2815_v27 = vld [vmem:[#allocation18 + $0xa4] sm:$0xf0] }
  0xdb   :  { %v709_v60 = vmax.f32 %v648_v52, 0.0  ;;  %v2370_v52 = vld [vmem:[#allocation16 + $0xa8] sm:$0xf]  ;;  %v2363_v53 = vor.u32 %v2784_v47, %v2362_v46  ;;  %v2772_v43 = vld [vmem:[#allocation16 + $0x4c] sm:$0xf0] }
  0xdc   :  { %v712_v54 = vmax.f32 %v622_v50, 0.0  ;;  %v2364_v50 = vld [vmem:[#allocation16 + $0xb0] sm:$0xf0]  ;;  %1328 = vmatpush.bf16.msrb.mxu3 %v2391_v48  ;;  %v2315_v45 = vor.u32 %v2772_v43, %v2314_v42  ;;  %v2322_v47 = vld [vmem:[#allocation16 + $0x48] sm:$0xf] }
  0xdd   :  { %v635_v56 = vpop.f32.mrf.mxu2  ;;  %1314 = vmatpush.bf16.msrb.mxu2 %v2387_v44  ;;  %1287 = vmatpush.bf16.msrb.mxu0 %v2363_v53  ;;  %v2770_v44 = vld [vmem:[#allocation16 + $0x44] sm:$0xf]  ;;  %v2316_v46 = vld [vmem:[#allocation16 + $0x50] sm:$0xf0]  ;;  %v2773_v48 = vld [vmem:[#allocation16 + $0x54] sm:$0xf0] }
  0xde   :  { %v636_v57 = vadd.f32 %v635_v56, %v259_v37  ;;  %v716_v59 = vpack.c.bf16 %v712_v54, %v708_v49  ;;  %v2786_v37 = vld [vmem:[#allocation16 + $0xc4] sm:$0xf]  ;;  %v2785_v54 = vld [vmem:[#allocation16 + $0xb4] sm:$0xf0]  ;;  %v2783_v56 = vld [vmem:[#allocation16 + $0xac] sm:$0xf] }
  0xdf   :  { %v2383_v40 = vor.u32 %v2786_v37, %v2380_v38  ;;  %v2782_v49 = vld [vmem:[#allocation16 + $0xa4] sm:$0xf]  ;;  %v2335_v37 = vor.u32 %v2774_v32, %v2332_v34  ;;  %v2339_v38 = vor.u32 %v2777_v36, %v2338_v35  ;;  %v2324_v53 = vld [vmem:[#allocation16 + $0x58] sm:$0xf0]  ;;  %v2450_v32 = vld [vmem:[#allocation18 + $0x50] sm:$0xf] }
  0xe0   :  { %v649_v58 = vpop.f32.mrf.mxu3  ;;  %988 = vmatmul.bf16.vlgmr.msra.gmra.mxu0 %v716_v59  ;;  %v2367_v59 = vor.u32 %v2782_v49, %v2364_v50  ;;  %v2319_v49 = vor.u32 %v2770_v44, %v2316_v46  ;;  %v2323_v50 = vor.u32 %v2773_v48, %v2322_v47  ;;  %v2514_v34 = vld [vmem:[#allocation18 + $0xd0] sm:$0xf]  ;;  %v2821_v35 = vld [vmem:[#allocation18 + $0xd4] sm:$0xf0]  ;;  %v2586_v36 = vld [vmem:[#allocation18 + $0x160] sm:$0xf] }
  0xe1   :  { %v650_v61 = vadd.f32 %v649_v58, %v636_v57  ;;  %v2372_v57 = vld [vmem:[#allocation16 + $0xb8] sm:$0xf0]  ;;  %v2875_v58 = vld [vmem:[#allocation11] ss:$0 sm:$0xff]  ;;  %1300 = vmatpush.bf16.msrb.mxu1 %v2383_v40  ;;  %v2855_v42 = vld [vmem:[#allocation18 + $0x1e4] sm:$0xf0] }
  0xe2   :  { %v2375_v62 = vor.u32 %v2783_v56, %v2372_v57  ;;  %v2340_v40 = vld [vmem:[#allocation16 + $0x78] sm:$0xf0]  ;;  %v2298_v56 = vld [vmem:[#allocation16 + $0x20] sm:$0xf]  ;;  %v2768_v57 = vld [vmem:[#allocation16 + $0x2c] sm:$0xf0] }
  0xe3   :  { %v713_v63 = vmax.f32 %v650_v61, 0.0  ;;  %v2343_v41 = vor.u32 %v2775_v39, %v2340_v40  ;;  %v1045_v39 = vstv %s3296_s22  ;;  %v2803_v46 = vld [vmem:[#allocation18 + $0x44] sm:$0xf0]  ;;  %v2880_v28 = vld [vmem:[#allocation15] ss:$0 sm:$0xff] }
  0xe4   :  { %1329 = vmatpush.bf16.msrb.mxu3 %v2375_v62  ;;  %v2769_v62 = vld [vmem:[#allocation16 + $0x34] sm:$0xf0] }
  0xe5   :  { %v717_v0 = vpack.c.bf16 %v713_v63, %v709_v60  ;;  %v2371_v60 = vor.u32 %v2785_v54, %v2370_v52  ;;  %1301 = vmatpush.bf16.msrb.mxu1 %v2367_v59  ;;  %v2771_v52 = vld [vmem:[#allocation16 + $0x4c] sm:$0xf]  ;;  %v2299_v59 = vor.u32 %v2768_v57, %v2298_v56  ;;  %v2506_v57 = vld [vmem:[#allocation18 + $0xc0] sm:$0xf] }
  0xe6   :  { %v2327_v54 = vor.u32 %v2771_v52, %v2324_v53  ;;  %v2837_v52 = vld [vmem:[#allocation18 + $0x154] sm:$0xf0]  ;;  %v2642_v53 = vld [vmem:[#allocation18 + $0x1d0] sm:$0xf] }
  0xe7   :  { %1002 = vmatmul.bf16.vlgmr.msra.gmra.mxu1 %v717_v0  ;;  %1315 = vmatpush.bf16.msrb.mxu2 %v2371_v60  ;;  %v2300_v60 = vld [vmem:[#allocation16 + $0x30] sm:$0xf0] }
  0xe8   :  { %1330 = vmatpush.bf16.msrb.mxu3 %v2359_v29 }
  0xeb   :  { %1316 = vmatpush.bf16.msrb.mxu2 %v2355_v26  ;;  %v2841_v26 = vld [vmem:[#allocation18 + $0x174] sm:$0xf0] }
  0xec   :  { %1331 = vmatpush.bf16.msrb.mxu3 %v2343_v41  ;;  %v2595_v30 = vor.u32 %v2841_v26, %v2594_v24  ;;  %v2650_v41 = vld [vmem:[#allocation18 + $0x1e0] sm:$0xf] }
  0xed   :  { %v2651_v44 = vor.u32 %v2855_v42, %v2650_v41  ;;  %v2490_v26 = vld [vmem:[#allocation18 + $0xa0] sm:$0xf] }
  0xee   :  { %v661_v1 = vpop.f32.mrf.mxu0  ;;  %v2491_v41 = vor.u32 %v2815_v27, %v2490_v26  ;;  %v2660_v26 = vld [vmem:[#allocation18 + $0x1f8] sm:$0xf0]  ;;  %v2804_v27 = vld [vmem:[#allocation18 + $0x54] sm:$0xf] }
  0xef   :  { %v675_v3 = vpop.f32.mrf.mxu1  ;;  %v662_v4 = vadd.f32 %v661_v1, %v260_v2  ;;  %1317 = vmatpush.bf16.msrb.mxu2 %v2339_v38 }
  0xf0   :  { %1332 = vmatpush.bf16.msrb.mxu3 %v2327_v54 }
  0xf1   :  { %v676_v9 = vadd.f32 %v675_v3, %v662_v4  ;;  %v2876_v4 = vld [vmem:[%s3317_s5 + $0x1] ss:$0 sm:$0xff] }
  0xf3   :  { %v710_v14 = vmax.f32 %v676_v9, 0.0  ;;  %1318 = vmatpush.bf16.msrb.mxu2 %v2323_v50  ;;  %v2578_v50 = vld [vmem:[#allocation18 + $0x150] sm:$0xf] }
  0xf6   :  { %v689_v5 = vpop.f32.mrf.mxu2  ;;  %v663_v8 = vpop.f32.mrf.mxu0 }
  0xf7   :  { %v703_v7 = vpop.f32.mrf.mxu3  ;;  %v664_v10 = vadd.f32 %v663_v8, %v260_v2  ;;  %v677_v11 = vpop.f32.mrf.mxu1  ;;  %v690_v13 = vadd.f32 %v689_v5, %v261_v6  ;;  %v2877_v5 = vld [vmem:[%s3317_s5] ss:$0 sm:$0xff]  ;;  %s3294_s5 = sld [smem:[#allocation12 + $0x1]] }
  0xf9   :  { %v678_v12 = vadd.f32 %v677_v11, %v664_v10  ;;  %v704_v18 = vadd.f32 %v703_v7, %v690_v13 }
  0xfb   :  { %v714_v15 = vmax.f32 %v678_v12, 0.0  ;;  %v711_v20 = vmax.f32 %v704_v18, 0.0 }
  0xfd   :  { %v718_v16 = vpack.c.bf16 %v714_v15, %v710_v14  ;;  %v1057_v38 = vstv %s3294_s5 }
  0xfe   :  { %v691_v17 = vpop.f32.mrf.mxu2 }
  0xff   :  { %v692_v19 = vadd.f32 %v691_v17, %v261_v6  ;;  %v705_v51 = vpop.f32.mrf.mxu3  ;;  %1016 = vmatmul.bf16.vlgmr.msra.gmra.mxu2 %v718_v16 }
 0x101   :  { %v706_v55 = vadd.f32 %v705_v51, %v692_v19  ;;  %v2346_v51 = vld [vmem:[#allocation16 + $0x80] sm:$0xf] }
 0x103   :  { %v715_v21 = vmax.f32 %v706_v55, 0.0  ;;  %v2780_v55 = vld [vmem:[#allocation16 + $0x8c] sm:$0xf0] }
 0x105   :  { %v719_v22 = vpack.c.bf16 %v715_v21, %v711_v20  ;;  %v2778_v20 = vld [vmem:[#allocation16 + $0x84] sm:$0xf]  ;;  %v2347_v21 = vor.u32 %v2780_v55, %v2346_v51  ;;  %v2825_v51 = vld [vmem:[#allocation18 + $0xf4] sm:$0xf0]  ;;  %v2458_v55 = vld [vmem:[#allocation18 + $0x60] sm:$0xf] }
 0x107   :  { %1030 = vmatmul.bf16.vlgmr.msra.gmra.mxu3 %v719_v22  ;;  %v2348_v22 = vld [vmem:[#allocation16 + $0x90] sm:$0xf0]  ;;  %1288 = vmatpush.bf16.msrb.mxu0 %v2347_v21 }
 0x108   :  { %v2351_v25 = vor.u32 %v2778_v20, %v2348_v22  ;;  %v2807_v20 = vld [vmem:[#allocation18 + $0x64] sm:$0xf0]  ;;  %v2522_v22 = vld [vmem:[#allocation18 + $0xe0] sm:$0xf] }
 0x109   :  { %v2523_v29 = vor.u32 %v2823_v23, %v2522_v22  ;;  %v2426_v22 = vld [vmem:[#allocation18 + $0x20] sm:$0xf]  ;;  %v2799_v23 = vld [vmem:[#allocation18 + $0x24] sm:$0xf0] }
 0x10a   :  { %1302 = vmatpush.bf16.msrb.mxu1 %v2351_v25  ;;  %v2459_v25 = vor.u32 %v2807_v20, %v2458_v55 }
 0x10b   :  { %1289 = vmatpush.bf16.msrb.mxu0 %v2331_v33  ;;  %v2805_v33 = vld [vmem:[#allocation18 + $0x54] sm:$0xf0] }
 0x10c   :  { %v2451_v43 = vor.u32 %v2805_v33, %v2450_v32  ;;  %v2831_v32 = vld [vmem:[#allocation18 + $0x124] sm:$0xf0] }
 0x10e   :  { %1303 = vmatpush.bf16.msrb.mxu1 %v2335_v37  ;;  %v2839_v37 = vld [vmem:[#allocation18 + $0x164] sm:$0xf0] }
 0x10f   :  { %1290 = vmatpush.bf16.msrb.mxu0 %v2315_v45  ;;  %v2587_v40 = vor.u32 %v2839_v37, %v2586_v36  ;;  %v2442_v45 = vld [vmem:[#allocation18 + $0x40] sm:$0xf]  ;;  %v2427_v36 = vor.u32 %v2799_v23, %v2426_v22  ;;  %v2840_v22 = vld [vmem:[#allocation18 + $0x174] sm:$0xf]  ;;  %v2596_v23 = vld [vmem:[#allocation18 + $0x178] sm:$0xf0] }
 0x110   :  { %v2618_v37 = vld [vmem:[#allocation18 + $0x1a0] sm:$0xf] }
 0x112   :  { %1304 = vmatpush.bf16.msrb.mxu1 %v2319_v49  ;;  %v2515_v49 = vor.u32 %v2821_v35, %v2514_v34 }
 0x113   :  { %1291 = vmatpush.bf16.msrb.mxu0 %v2299_v59  ;;  %v2853_v59 = vld [vmem:[#allocation18 + $0x1d4] sm:$0xf0] }
 0x15d   :  { %v989_v61 = vpop.f32.mrf.mxu0 }
 0x15e   :  { %v990_v0 = vadd.f32 %v2875_v58, %v989_v61  ;;  %v2306_v61 = vld [vmem:[#allocation16 + $0x28] sm:$0xf] }
 0x164   :  { %v1003_v63 = vpop.f32.mrf.mxu1 }
 0x165   :  { %v1004_v2 = vadd.f32 %v1003_v63, %v990_v0  ;;  %v991_v6 = vpop.f32.mrf.mxu0  ;;  %v2307_v0 = vor.u32 %v2769_v62, %v2306_v61  ;;  %v2879_v61 = vld [vmem:[#allocation13] ss:$0 sm:$0xff]  ;;  %v2579_v62 = vor.u32 %v2837_v52, %v2578_v50 }
 0x166   :  { %v992_v10 = vadd.f32 %v2875_v58, %v991_v6  ;;  %v2766_v58 = vld [vmem:[#allocation16 + $0x24] sm:$0xf] }
 0x167   :  { %v2303_v63 = vor.u32 %v2766_v58, %v2300_v60  ;;  %1319 = vmatpush.bf16.msrb.mxu2 %v2307_v0  ;;  %v2762_v6 = vld [vmem:[#allocation16 + $0x4] sm:$0xf]  ;;  %v2819_v58 = vld [vmem:[#allocation18 + $0xc4] sm:$0xf0]  ;;  %v2878_v60 = vld [vmem:[#allocation13 + $0x1] ss:$0 sm:$0xff] }
 0x168   :  { %v2570_v0 = vld [vmem:[#allocation18 + $0x140] sm:$0xf] }
 0x169   :  { %1305 = vmatpush.bf16.msrb.mxu1 %v2303_v63  ;;  %v2643_v63 = vor.u32 %v2853_v59, %v2642_v53 }
 0x16c   :  { %v1005_v9 = vpop.f32.mrf.mxu1 }
 0x16d   :  { %v1006_v14 = vadd.f32 %v1005_v9, %v992_v10  ;;  %v2290_v9 = vld [vmem:[#allocation16 + $0x8] sm:$0xf]  ;;  %v2765_v10 = vld [vmem:[#allocation16 + $0x14] sm:$0xf0] }
 0x182   :  { %v1017_v1 = vpop.f32.mrf.mxu2 }
 0x183   :  { %v1018_v3 = vadd.f32 %v1017_v1, %v1004_v2  ;;  %v2767_v1 = vld [vmem:[#allocation16 + $0x2c] sm:$0xf]  ;;  %v2308_v2 = vld [vmem:[#allocation16 + $0x38] sm:$0xf0] }
 0x18a   :  { %v1031_v7 = vpop.f32.mrf.mxu3  ;;  %v1019_v13 = vpop.f32.mrf.mxu2 }
 0x18b   :  { %v1032_v8 = vadd.f32 %v1031_v7, %v1018_v3  ;;  %v1020_v15 = vadd.f32 %v1019_v13, %v1006_v14  ;;  %v2311_v3 = vor.u32 %v2767_v1, %v2308_v2  ;;  %v2763_v13 = vld [vmem:[#allocation16 + $0xc] sm:$0xf]  ;;  %v2292_v14 = vld [vmem:[#allocation16 + $0x18] sm:$0xf0] }
 0x18d   :  { %v1050_v11 = vmul.f32 %v2876_v4, %v1032_v8  ;;  %v1038_v12 = vmul.f32 %v2877_v5, %v1032_v8  ;;  %1333 = vmatpush.bf16.msrb.mxu3 %v2311_v3  ;;  %v2284_v8 = vld [vmem:[#allocation16 + $0x10] sm:$0xf0]  ;;  %v2443_v3 = vor.u32 %v2803_v46, %v2442_v45  ;;  %v2813_v45 = vld [vmem:[#allocation18 + $0x94] sm:$0xf0] }
 0x18f   :  { %1052 = vadd.xlane.f32.xlu1 %v1050_v11  ;;  %1040 = vadd.xlane.f32.xlu0 %v1038_v12  ;;  %v2287_v11 = vor.u32 %v2762_v6, %v2284_v8  ;;  %v2291_v12 = vor.u32 %v2765_v10, %v2290_v9  ;;  %v2507_v6 = vor.u32 %v2819_v58, %v2506_v57  ;;  %v2801_v8 = vld [vmem:[#allocation18 + $0x34] sm:$0xf0]  ;;  %v2851_v9 = vld [vmem:[#allocation18 + $0x1c4] sm:$0xf0]  ;;  %v2498_v10 = vld [vmem:[#allocation18 + $0xb0] sm:$0xf] }
 0x190   :  { %v2474_v57 = vld [vmem:[#allocation18 + $0x80] sm:$0xf]  ;;  %v2811_v58 = vld [vmem:[#allocation18 + $0x84] sm:$0xf0] }
 0x191   :  { %1306 = vmatpush.bf16.msrb.mxu1 %v2287_v11  ;;  %1320 = vmatpush.bf16.msrb.mxu2 %v2291_v12  ;;  %v2817_v11 = vld [vmem:[#allocation18 + $0xb4] sm:$0xf0] }
 0x192   :  { %v1033_v16 = vpop.f32.mrf.mxu3 }
 0x193   :  { %v1034_v17 = vadd.f32 %v1033_v16, %v1020_v15  ;;  %v2295_v15 = vor.u32 %v2763_v13, %v2292_v14  ;;  %v2466_v16 = vld [vmem:[#allocation18 + $0x70] sm:$0xf] }
 0x194   :  { %v2562_v14 = vld [vmem:[#allocation18 + $0x130] sm:$0xf] }
 0x195   :  { %v1051_v18 = vmul.f32 %v2876_v4, %v1034_v17  ;;  %v1039_v19 = vmul.f32 %v2877_v5, %v1034_v17  ;;  %v2282_v4 = vld [vmem:[#allocation16] sm:$0xf]  ;;  %v2764_v5 = vld [vmem:[#allocation16 + $0xc] sm:$0xf0]  ;;  %1334 = vmatpush.bf16.msrb.mxu3 %v2295_v15  ;;  %v2809_v17 = vld [vmem:[#allocation18 + $0x74] sm:$0xf0]  ;;  %1771 = vmatpush.bf16.msra.mxu2 %v2595_v30 }
 0x196   :  { %v2283_v7 = vor.u32 %v2764_v5, %v2282_v4  ;;  %v2835_v4 = vld [vmem:[#allocation18 + $0x144] sm:$0xf0]  ;;  %v2634_v5 = vld [vmem:[#allocation18 + $0x1c0] sm:$0xf] }
 0x197   :  { %1054 = vadd.xlane.f32.xlu1 %v1051_v18  ;;  %1042 = vadd.xlane.f32.xlu0 %v1039_v19  ;;  %v2530_v18 = vld [vmem:[#allocation18 + $0xf0] sm:$0xf]  ;;  %v2467_v19 = vor.u32 %v2809_v17, %v2466_v16  ;;  %v2571_v12 = vor.u32 %v2835_v4, %v2570_v0  ;;  %v2635_v13 = vor.u32 %v2851_v9, %v2634_v5  ;;  %v2808_v0 = vld [vmem:[#allocation18 + $0x74] sm:$0xf]  ;;  %v2532_v4 = vld [vmem:[#allocation18 + $0xf8] sm:$0xf0] }
 0x198   :  { %1292 = vmatpush.bf16.msrb.mxu0 %v2283_v7  ;;  %v2531_v21 = vor.u32 %v2825_v51, %v2530_v18  ;;  %v2434_v7 = vld [vmem:[#allocation18 + $0x30] sm:$0xf]  ;;  %v2833_v18 = vld [vmem:[#allocation18 + $0x134] sm:$0xf0] }
 0x199   :  { %1785 = vmatpush.bf16.msra.mxu3 %v2659_v31  ;;  %1772 = vmatpush.bf16.msra.mxu2 %v2587_v40  ;;  %v2435_v17 = vor.u32 %v2801_v8, %v2434_v7  ;;  %v2849_v51 = vld [vmem:[#allocation18 + $0x1b4] sm:$0xf0]  ;;  %v2554_v31 = vld [vmem:[#allocation18 + $0x120] sm:$0xf]  ;;  %v2847_v40 = vld [vmem:[#allocation18 + $0x1a4] sm:$0xf0] }
 0x19a   :  { %1757 = vmatpush.bf16.msra.mxu1 %v2531_v21  ;;  %v2499_v21 = vor.u32 %v2817_v11, %v2498_v10  ;;  %v2555_v46 = vor.u32 %v2831_v32, %v2554_v31  ;;  %v2546_v5 = vld [vmem:[#allocation18 + $0x110] sm:$0xf]  ;;  %v2845_v10 = vld [vmem:[#allocation18 + $0x194] sm:$0xf0]  ;;  %v2516_v31 = vld [vmem:[#allocation18 + $0xd8] sm:$0xf0] }
 0x19b   :  { %v2610_v9 = vld [vmem:[#allocation18 + $0x190] sm:$0xf] }
 0x19c   :  { %1743 = vmatpush.bf16.msra.mxu0 %v2467_v19  ;;  %v2626_v19 = vld [vmem:[#allocation18 + $0x1b0] sm:$0xf]  ;;  %v2611_v11 = vor.u32 %v2845_v10, %v2610_v9  ;;  %v2564_v9 = vld [vmem:[#allocation18 + $0x138] sm:$0xf0]  ;;  %v2848_v10 = vld [vmem:[#allocation18 + $0x1b4] sm:$0xf] }
 0x19d   :  { %1786 = vmatpush.bf16.msra.mxu3 %v2651_v44  ;;  %1773 = vmatpush.bf16.msra.mxu2 %v2579_v62  ;;  %v2627_v30 = vor.u32 %v2849_v51, %v2626_v19  ;;  %v2482_v44 = vld [vmem:[#allocation18 + $0x90] sm:$0xf] }
 0x19e   :  { %1758 = vmatpush.bf16.msra.mxu1 %v2523_v29  ;;  %v2563_v29 = vor.u32 %v2833_v18, %v2562_v14  ;;  %v2483_v52 = vor.u32 %v2813_v45, %v2482_v44  ;;  %v2822_v14 = vld [vmem:[#allocation18 + $0xe4] sm:$0xf]  ;;  %v2827_v18 = vld [vmem:[#allocation18 + $0x104] sm:$0xf0]  ;;  %v2508_v44 = vld [vmem:[#allocation18 + $0xc8] sm:$0xf0] }
 0x1a0   :  { %1744 = vmatpush.bf16.msra.mxu0 %v2459_v25 }
 0x1a1   :  { %1787 = vmatpush.bf16.msra.mxu3 %v2643_v63  ;;  %1774 = vmatpush.bf16.msra.mxu2 %v2571_v12  ;;  %v2475_v63 = vor.u32 %v2811_v58, %v2474_v57  ;;  %v2806_v12 = vld [vmem:[#allocation18 + $0x64] sm:$0xf]  ;;  %v2500_v58 = vld [vmem:[#allocation18 + $0xb8] sm:$0xf0] }
 0x1a2   :  { %1759 = vmatpush.bf16.msra.mxu1 %v2515_v49 }
 0x1a4   :  { %1745 = vmatpush.bf16.msra.mxu0 %v2451_v43 }
 0x1a5   :  { %1788 = vmatpush.bf16.msra.mxu3 %v2635_v13  ;;  %1775 = vmatpush.bf16.msra.mxu2 %v2563_v29  ;;  %v2460_v13 = vld [vmem:[#allocation18 + $0x68] sm:$0xf0]  ;;  %v2452_v29 = vld [vmem:[#allocation18 + $0x58] sm:$0xf0] }
 0x1a6   :  { %1760 = vmatpush.bf16.msra.mxu1 %v2507_v6  ;;  %v2829_v6 = vld [vmem:[#allocation18 + $0x114] sm:$0xf0]  ;;  %v2455_v32 = vor.u32 %v2804_v27, %v2452_v29  ;;  %v2476_v27 = vld [vmem:[#allocation18 + $0x88] sm:$0xf0] }
 0x1a7   :  { %v2547_v8 = vor.u32 %v2829_v6, %v2546_v5  ;;  %v2492_v6 = vld [vmem:[#allocation18 + $0xa8] sm:$0xf0] }
 0x1a8   :  { %1746 = vmatpush.bf16.msra.mxu0 %v2443_v3 }
 0x1a9   :  { %1789 = vmatpush.bf16.msra.mxu3 %v2627_v30  ;;  %1776 = vmatpush.bf16.msra.mxu2 %v2555_v46  ;;  %v2820_v30 = vld [vmem:[#allocation18 + $0xd4] sm:$0xf] }
 0x1aa   :  { %1761 = vmatpush.bf16.msra.mxu1 %v2499_v21  ;;  %v2836_v46 = vld [vmem:[#allocation18 + $0x154] sm:$0xf] }
 0x1ac   :  { %1747 = vmatpush.bf16.msra.mxu0 %v2435_v17  ;;  %v2538_v17 = vld [vmem:[#allocation18 + $0x100] sm:$0xf] }
 0x1ad   :  { %1777 = vmatpush.bf16.msra.mxu2 %v2547_v8  ;;  %v2539_v51 = vor.u32 %v2827_v18, %v2538_v17  ;;  %v2832_v8 = vld [vmem:[#allocation18 + $0x134] sm:$0xf]  ;;  %v2484_v18 = vld [vmem:[#allocation18 + $0x98] sm:$0xf0] }
 0x1ae   :  { %1762 = vmatpush.bf16.msra.mxu1 %v2491_v41 }
 0x1b0   :  { %1748 = vmatpush.bf16.msra.mxu0 %v2427_v36  ;;  %v2854_v36 = vld [vmem:[#allocation18 + $0x1e4] sm:$0xf] }
 0x1b1   :  { %1778 = vmatpush.bf16.msra.mxu2 %v2539_v51  ;;  %v2556_v51 = vld [vmem:[#allocation18 + $0x128] sm:$0xf0] }
 0x1b2   :  { %1763 = vmatpush.bf16.msra.mxu1 %v2483_v52 }
 0x1b6   :  { %1764 = vmatpush.bf16.msra.mxu1 %v2475_v63 }
 0x202   :  { %v1053_v47 = vpop.xlane.xlu1 %1052  ;;  %v1041_v48 = vpop.xlane.xlu0 %1040 }
 0x203   :  { %v1058_v54 = vadd.f32 %v1057_v38, %v1053_v47  ;;  %v1046_v56 = vadd.f32 %v1045_v39, %v1041_v48  ;;  %v2619_v47 = vor.u32 %v2847_v40, %v2618_v37  ;;  %v2652_v40 = vld [vmem:[#allocation18 + $0x1e8] sm:$0xf0] }
 0x204   :  { %v2655_v41 = vor.u32 %v2854_v36, %v2652_v40  ;;  %v2826_v36 = vld [vmem:[#allocation18 + $0x104] sm:$0xf] }
 0x205   :  { %v1062_v1 = vmax.f32 %v1058_v54, 0.0  ;;  %v1060_v2 = vmax.f32 %v1046_v56, 0.0  ;;  %v2410_v54 = vld [vmem:[#allocation18] sm:$0xf]  ;;  %1790 = vmatpush.bf16.msra.mxu3 %v2619_v47  ;;  %v2795_v56 = vld [vmem:[#allocation18 + $0x4] sm:$0xf0] }
 0x206   :  { %v2411_v62 = vor.u32 %v2795_v56, %v2410_v54  ;;  %v2580_v47 = vld [vmem:[#allocation18 + $0x158] sm:$0xf0]  ;;  %v2816_v56 = vld [vmem:[#allocation18 + $0xb4] sm:$0xf]  ;;  %v2842_v40 = vld [vmem:[#allocation18 + $0x184] sm:$0xf] }
 0x207   :  { %v1070_v15 = vmul.f32 %v2878_v60, %v1062_v1  ;;  %v1066_v16 = vmul.f32 %v2879_v61, %v1060_v2  ;;  %v2468_v1 = vld [vmem:[#allocation18 + $0x78] sm:$0xf0]  ;;  %v2824_v2 = vld [vmem:[#allocation18 + $0xf4] sm:$0xf] }
 0x208   :  { %v2471_v3 = vor.u32 %v2808_v0, %v2468_v1  ;;  %v2535_v7 = vor.u32 %v2824_v2, %v2532_v4  ;;  %v2436_v54 = vld [vmem:[#allocation18 + $0x38] sm:$0xf0]  ;;  %v2636_v0 = vld [vmem:[#allocation18 + $0x1c8] sm:$0xf0]  ;;  %v2798_v2 = vld [vmem:[#allocation18 + $0x24] sm:$0xf] }
 0x209   :  { %v1072_v33 = vadd.f32 %v1070_v15, %v1066_v16  ;;  %1791 = vmatpush.bf16.msra.mxu3 %v2611_v11  ;;  %v2463_v15 = vor.u32 %v2806_v12, %v2460_v13  ;;  %v2524_v16 = vld [vmem:[#allocation18 + $0xe8] sm:$0xf0]  ;;  %v2814_v4 = vld [vmem:[#allocation18 + $0xa4] sm:$0xf]  ;;  %v2567_v11 = vor.u32 %v2832_v8, %v2564_v9  ;;  %v2628_v12 = vld [vmem:[#allocation18 + $0x1b8] sm:$0xf0] }
 0x20a   :  { %v1055_v55 = vpop.xlane.xlu1 %1054  ;;  %v1043_v20 = vpop.xlane.xlu0 %1042  ;;  %v2527_v19 = vor.u32 %v2822_v14, %v2524_v16  ;;  %v2631_v13 = vor.u32 %v2848_v10, %v2628_v12  ;;  %v2796_v14 = vld [vmem:[#allocation18 + $0x14] sm:$0xf] }
 0x20b   :  { %v1059_v24 = vadd.f32 %v1057_v38, %v1055_v55  ;;  %v1047_v25 = vadd.f32 %v1045_v39, %v1043_v20  ;;  %v2418_v38 = vld [vmem:[#allocation18 + $0x10] sm:$0xf]  ;;  %v2797_v39 = vld [vmem:[#allocation18 + $0x14] sm:$0xf0]  ;;  %v1078_v48 = vadd.f32 %v2880_v28, %v1072_v33  ;;  %v2602_v55 = vld [vmem:[#allocation18 + $0x180] sm:$0xf]  ;;  %v2519_v33 = vor.u32 %v2820_v30, %v2516_v31 }
 0x20c   :  { %v2419_v50 = vor.u32 %v2797_v39, %v2418_v38  ;;  %v2843_v20 = vld [vmem:[#allocation18 + $0x184] sm:$0xf0]  ;;  %v2802_v38 = vld [vmem:[#allocation18 + $0x44] sm:$0xf]  ;;  %v2444_v39 = vld [vmem:[#allocation18 + $0x48] sm:$0xf0] }
 0x20d   :  { %v1063_v34 = vmax.f32 %v1059_v24, 0.0  ;;  %v1061_v35 = vmax.f32 %v1047_v25, 0.0  ;;  %v1080_v59 = vmax.f32 %v1078_v48, 0.0  ;;  %v2603_v21 = vor.u32 %v2843_v20, %v2602_v55  ;;  %v2856_v24 = vld [vmem:[#allocation18 + $0x1f4] sm:$0xf] }
 0x20e   :  { %1749 = vmatpush.bf16.msra.mxu0 %v2419_v50  ;;  %v2599_v25 = vor.u32 %v2840_v22, %v2596_v23  ;;  %v2852_v48 = vld [vmem:[#allocation18 + $0x1d4] sm:$0xf]  ;;  %v2644_v50 = vld [vmem:[#allocation18 + $0x1d8] sm:$0xf0]  ;;  %v2620_v22 = vld [vmem:[#allocation18 + $0x1a8] sm:$0xf0] }
 0x20f   :  { %v1071_v42 = vmul.f32 %v2878_v60, %v1063_v34  ;;  %v1067_v43 = vmul.f32 %v2879_v61, %v1061_v35  ;;  %1792 = vmatpush.bf16.msra.mxu3 %v2603_v21  ;;  %v2838_v34 = vld [vmem:[#allocation18 + $0x164] sm:$0xf]  ;;  %v2588_v35 = vld [vmem:[#allocation18 + $0x168] sm:$0xf0]  ;;  %v2647_v52 = vor.u32 %v2852_v48, %v2644_v50  ;;  %v2812_v16 = vld [vmem:[#allocation18 + $0x94] sm:$0xf] }
 0x210   :  { %v2591_v37 = vor.u32 %v2838_v34, %v2588_v35  ;;  %v2487_v55 = vor.u32 %v2812_v16, %v2484_v18  ;;  %v2846_v21 = vld [vmem:[#allocation18 + $0x1a4] sm:$0xf]  ;;  %v2828_v30 = vld [vmem:[#allocation18 + $0x114] sm:$0xf]  ;;  %v2548_v31 = vld [vmem:[#allocation18 + $0x118] sm:$0xf0] }
 0x211   :  { %v1073_v49 = vadd.f32 %v1071_v42, %v1067_v43  ;;  %v2818_v42 = vld [vmem:[#allocation18 + $0xc4] sm:$0xf]  ;;  %v2447_v43 = vor.u32 %v2802_v38, %v2444_v39  ;;  %v2551_v34 = vor.u32 %v2828_v30, %v2548_v31 }
 0x212   :  { %1750 = vmatpush.bf16.msra.mxu0 %v2411_v62  ;;  %v2511_v45 = vor.u32 %v2818_v42, %v2508_v44  ;;  %v2850_v62 = vld [vmem:[#allocation18 + $0x1c4] sm:$0xf] }
 0x213   :  { %v1079_v53 = vadd.f32 %v2880_v28, %v1073_v49  ;;  %v2663_v28 = vor.u32 %v2856_v24, %v2660_v26  ;;  %v2583_v49 = vor.u32 %v2836_v46, %v2580_v47  ;;  %v2639_v1 = vor.u32 %v2850_v62, %v2636_v0  ;;  %v2794_v23 = vld [vmem:[#allocation18 + $0x4] sm:$0xf] }
 0x214   :  { %v2623_v24 = vor.u32 %v2846_v21, %v2620_v22  ;;  %v2810_v26 = vld [vmem:[#allocation18 + $0x84] sm:$0xf] }
 0x215   :  { %v1081_v60 = vmax.f32 %v1079_v53, 0.0  ;;  %v2800_v53 = vld [vmem:[#allocation18 + $0x34] sm:$0xf]  ;;  %v2479_v29 = vor.u32 %v2810_v26, %v2476_v27  ;;  %v1417_v16 = vld [vmem:[%s3324_s12] sm:$0x3]  ;;  %s3163_s12 = smov [#allocation19]  }
 0x216   :  { %v2439_v57 = vor.u32 %v2800_v53, %v2436_v54  ;;  %v1420_v21 = vperm.slane %v1417_v16, 1  ;;  %s1867_s16 = sshll.u32 %s3163_s12, 4  ;;  %s1868_s16 = int_to_ptr.vmem [resolvable:$true] %s1867_s16 }
 0x217   :  { %v1082_v61 = vpack.c.bf16 %v1081_v60, %v1080_v59  ;;  %v2503_v59 = vor.u32 %v2816_v56, %v2500_v58  ;;  %v2834_v60 = vld [vmem:[#allocation18 + $0x144] sm:$0xf] }
 0x219   :  { %1293 = vmatmul.bf16.vlgmr.msrb.gmra.mxu0 %v1082_v61  ;;  %1307 = vmatmul.bf16.vlgmr.msrb.gmra.mxu1 %v1082_v61 }
 0x21a   :  { %1321 = vmatmul.bf16.vlgmr.msrb.gmra.mxu2 %v1082_v61  ;;  %1335 = vmatmul.bf16.vlgmr.msrb.gmra.mxu3 %v1082_v61  ;;  %v2572_v61 = vld [vmem:[#allocation18 + $0x148] sm:$0xf0] }
 0x21b   :  { %1799 = vmatpush.bf16.msrb.mxu0 %v2471_v3  ;;  %1813 = vmatpush.bf16.msrb.mxu1 %v2535_v7  ;;  %v2575_v63 = vor.u32 %v2834_v60, %v2572_v61  ;;  %v2428_v3 = vld [vmem:[#allocation18 + $0x28] sm:$0xf0]  ;;  %v2495_v7 = vor.u32 %v2814_v4, %v2492_v6 }
 0x21c   :  { %1827 = vmatpush.bf16.msrb.mxu2 %v2599_v25  ;;  %1841 = vmatpush.bf16.msrb.mxu3 %v2663_v28  ;;  %v2431_v5 = vor.u32 %v2798_v2, %v2428_v3  ;;  %v2412_v25 = vld [vmem:[#allocation18 + $0x8] sm:$0xf0] }
 0x21d   :  { %v2415_v28 = vor.u32 %v2794_v23, %v2412_v25 }
 0x21f   :  { %1800 = vmatpush.bf16.msrb.mxu0 %v2463_v15  ;;  %1814 = vmatpush.bf16.msrb.mxu1 %v2527_v19  ;;  %v2420_v15 = vld [vmem:[#allocation18 + $0x18] sm:$0xf0]  ;;  %v2830_v19 = vld [vmem:[#allocation18 + $0x124] sm:$0xf] }
 0x220   :  { %1828 = vmatpush.bf16.msrb.mxu2 %v2591_v37  ;;  %1842 = vmatpush.bf16.msrb.mxu3 %v2655_v41  ;;  %v2423_v17 = vor.u32 %v2796_v14, %v2420_v15  ;;  %v2559_v20 = vor.u32 %v2830_v19, %v2556_v51  ;;  %v2540_v37 = vld [vmem:[#allocation18 + $0x108] sm:$0xf0]  ;;  %v1115_v41 = vld [vmem:[%s3322_s10] sm:$0xf]  ;;  %v1419_v51 = vperm.slane %v1417_v16, 0 }
 0x221   :  { %v2543_v42 = vor.u32 %v2826_v36, %v2540_v37  ;;  %v1118_v46 = vperm.slane %v1115_v41, 1  ;;  %v1120_v58 = vperm.slane %v1115_v41, 3 }
 0x223   :  { %1801 = vmatpush.bf16.msrb.mxu0 %v2455_v32  ;;  %1815 = vmatpush.bf16.msrb.mxu1 %v2519_v33  ;;  %v2844_v32 = vld [vmem:[#allocation18 + $0x194] sm:$0xf]  ;;  %v2612_v33 = vld [vmem:[#allocation18 + $0x198] sm:$0xf0] }
 0x224   :  { %1829 = vmatpush.bf16.msrb.mxu2 %v2583_v49  ;;  %1843 = vmatpush.bf16.msrb.mxu3 %v2647_v52  ;;  %v2615_v35 = vor.u32 %v2844_v32, %v2612_v33 }
 0x227   :  { %1802 = vmatpush.bf16.msrb.mxu0 %v2447_v43  ;;  %1816 = vmatpush.bf16.msrb.mxu1 %v2511_v45  ;;  %v2604_v43 = vld [vmem:[#allocation18 + $0x188] sm:$0xf0]  ;;  %v1117_v45 = vperm.slane %v1115_v41, 0 }
 0x228   :  { %1830 = vmatpush.bf16.msrb.mxu2 %v2575_v63  ;;  %1844 = vmatpush.bf16.msrb.mxu3 %v2639_v1  ;;  %v2607_v44 = vor.u32 %v2842_v40, %v2604_v43 }
 0x22b   :  { %1803 = vmatpush.bf16.msrb.mxu0 %v2439_v57  ;;  %1817 = vmatpush.bf16.msrb.mxu1 %v2503_v59  ;;  %v1119_v57 = vperm.slane %v1115_v41, 2 }
 0x22c   :  { %1831 = vmatpush.bf16.msrb.mxu2 %v2567_v11  ;;  %1845 = vmatpush.bf16.msrb.mxu3 %v2631_v13 }
 0x22f   :  { %1804 = vmatpush.bf16.msrb.mxu0 %v2431_v5  ;;  %1818 = vmatpush.bf16.msrb.mxu1 %v2495_v7 }
 0x230   :  { %1832 = vmatpush.bf16.msrb.mxu2 %v2559_v20  ;;  %1846 = vmatpush.bf16.msrb.mxu3 %v2623_v24 }
 0x233   :  { %1805 = vmatpush.bf16.msrb.mxu0 %v2423_v17  ;;  %1819 = vmatpush.bf16.msrb.mxu1 %v2487_v55 }
 0x234   :  { %1833 = vmatpush.bf16.msrb.mxu2 %v2551_v34  ;;  %1847 = vmatpush.bf16.msrb.mxu3 %v2615_v35 }
 0x237   :  { %1806 = vmatpush.bf16.msrb.mxu0 %v2415_v28  ;;  %1820 = vmatpush.bf16.msrb.mxu1 %v2479_v29 }
 0x238   :  { %1834 = vmatpush.bf16.msrb.mxu2 %v2543_v42  ;;  %1848 = vmatpush.bf16.msrb.mxu3 %v2607_v44 }
 0x296   :  { %v1294_v38 = vpop.f32.mrf.mxu0  ;;  %v1308_v39 = vpop.f32.mrf.mxu1 }
 0x297   :  { %v1295_v47 = vadd.f32 %v1294_v38, %v1117_v45  ;;  %v1309_v48 = vadd.f32 %v1308_v39, %v1118_v46 }
 0x299   :  { %v1341_v59 = vmax.f32 %v1295_v47, 0.0  ;;  %v1342_v60 = vmax.f32 %v1309_v48, 0.0 }
 0x29d   :  { %v1322_v49 = vpop.f32.mrf.mxu2  ;;  %v1336_v50 = vpop.f32.mrf.mxu3 }
 0x29e   :  { %v1296_v52 = vpop.f32.mrf.mxu0  ;;  %v1310_v53 = vpop.f32.mrf.mxu1  ;;  %v1323_v1 = vadd.f32 %v1322_v49, %v1119_v57  ;;  %v1337_v2 = vadd.f32 %v1336_v50, %v1120_v58 }
 0x29f   :  { %v1297_v54 = vadd.f32 %v1296_v52, %v1117_v45  ;;  %v1311_v56 = vadd.f32 %v1310_v53, %v1118_v46 }
 0x2a0   :  { %v1343_v7 = vmax.f32 %v1323_v1, 0.0  ;;  %v1344_v8 = vmax.f32 %v1337_v2, 0.0 }
 0x2a1   :  { %v1345_v61 = vmax.f32 %v1297_v54, 0.0  ;;  %v1346_v62 = vmax.f32 %v1311_v56, 0.0 }
 0x2a3   :  { %v1349_v63 = vpack.c.bf16 %v1345_v61, %v1341_v59  ;;  %v1350_v0 = vpack.c.bf16 %v1346_v62, %v1342_v60 }
 0x2a5   :  { %v1324_v3 = vpop.f32.mrf.mxu2  ;;  %v1338_v4 = vpop.f32.mrf.mxu3  ;;  %1751 = vmatmul.bf16.vlgmr.msra.gmra.mxu0 %v1349_v63  ;;  %1765 = vmatmul.bf16.vlgmr.msra.gmra.mxu1 %v1350_v0 }
 0x2a6   :  { %v1325_v5 = vadd.f32 %v1324_v3, %v1119_v57  ;;  %v1339_v6 = vadd.f32 %v1338_v4, %v1120_v58 }
 0x2a8   :  { %v1347_v9 = vmax.f32 %v1325_v5, 0.0  ;;  %v1348_v10 = vmax.f32 %v1339_v6, 0.0 }
 0x2aa   :  { %v1351_v11 = vpack.c.bf16 %v1347_v9, %v1343_v7  ;;  %v1352_v12 = vpack.c.bf16 %v1348_v10, %v1344_v8 }
 0x2ac   :  { %1779 = vmatmul.bf16.vlgmr.msra.gmra.mxu2 %v1351_v11  ;;  %1793 = vmatmul.bf16.vlgmr.msra.gmra.mxu3 %v1352_v12 }
 0x2b5   :  { %1807 = vmatmul.bf16.vlgmr.msrb.gmra.mxu0 %v1349_v63  ;;  %1821 = vmatmul.bf16.vlgmr.msrb.gmra.mxu1 %v1350_v0 }
 0x2bc   :  { %1835 = vmatmul.bf16.vlgmr.msrb.gmra.mxu2 %v1351_v11  ;;  %1849 = vmatmul.bf16.vlgmr.msrb.gmra.mxu3 %v1352_v12 }
 0x322   :  { %v1752_v13 = vpop.f32.mrf.mxu0  ;;  %v1766_v14 = vpop.f32.mrf.mxu1 }
 0x323   :  { %v1753_v20 = vadd.f32 %v1752_v13, %v1419_v51 }
 0x325   :  { %v1767_v24 = vadd.f32 %v1766_v14, %v1753_v20 }
 0x32a   :  { %v1754_v15 = vpop.f32.mrf.mxu0  ;;  %v1768_v19 = vpop.f32.mrf.mxu1 }
 0x32b   :  { %v1755_v28 = vadd.f32 %v1754_v15, %v1419_v51 }
 0x32d   :  { %v1769_v35 = vadd.f32 %v1768_v19, %v1755_v28 }
 0x32f   :  { %v1780_v17 = vpop.f32.mrf.mxu2  ;;  %v1794_v18 = vpop.f32.mrf.mxu3 }
 0x330   :  { %v1781_v27 = vadd.f32 %v1780_v17, %v1767_v24 }
 0x332   :  { %v1808_v55 = vpop.f32.mrf.mxu0  ;;  %v1822_v26 = vpop.f32.mrf.mxu1  ;;  %v1795_v33 = vadd.f32 %v1794_v18, %v1781_v27 }
 0x333   :  { %v1809_v25 = vadd.f32 %v1808_v55, %v1420_v21 }
 0x334   :  { %v1855_v40 = vmax.f32 %v1795_v33, 0.0 }
 0x335   :  { %v1823_v29 = vadd.f32 %v1822_v26, %v1809_v25 }
 0x337   :  { %v1782_v22 = vpop.f32.mrf.mxu2  ;;  %v1796_v23 = vpop.f32.mrf.mxu3 }
 0x338   :  { %v1783_v41 = vadd.f32 %v1782_v22, %v1769_v35 }
 0x33a   :  { %v1810_v30 = vpop.f32.mrf.mxu0  ;;  %v1824_v39 = vpop.f32.mrf.mxu1  ;;  %v1797_v45 = vadd.f32 %v1796_v23, %v1783_v41 }
 0x33b   :  { %v1811_v36 = vadd.f32 %v1810_v30, %v1420_v21 }
 0x33c   :  { %v1857_v49 = vmax.f32 %v1797_v45, 0.0 }
 0x33d   :  { %v1825_v42 = vadd.f32 %v1824_v39, %v1811_v36 }
 0x33f   :  { %v1836_v31 = vpop.f32.mrf.mxu2  ;;  %v1850_v32 = vpop.f32.mrf.mxu3 }
 0x340   :  { %v1837_v34 = vadd.f32 %v1836_v31, %v1823_v29 }
 0x342   :  { %v1851_v37 = vadd.f32 %v1850_v32, %v1837_v34 }
 0x344   :  { %v1856_v38 = vmax.f32 %v1851_v37, 0.0 }
 0x346   :  { %v1859_v43 = vpack.c.bf16 %v1856_v38, %v1855_v40 }
 0x347   :  { %v1838_v44 = vpop.f32.mrf.mxu2  ;;  %v1852_v47 = vpop.f32.mrf.mxu3 }
 0x348   :  { %1861 = vst [vmem:[#allocation19] sm:$0xff] %v1859_v43  ;;  %v1839_v46 = vadd.f32 %v1838_v44, %v1825_v42 }
 0x34a   :  { %v1853_v48 = vadd.f32 %v1852_v47, %v1839_v46 }
 0x34c   :  { %v1858_v50 = vmax.f32 %v1853_v48, 0.0 }
 0x34e   :  { %v1860_v52 = vpack.c.bf16 %v1858_v50, %v1857_v49 }
 0x350   :  { %1862 = vst [vmem:[#allocation19 + $0x8] sm:$0xff] %v1860_v52 }
 0x351   :  { %1875 = dma.vmem_to_hbm [thread:$0]  %s1868_s16, 256, %s1870_s2, [#allocation4], %s3156_s1, %s3156_s1, %s3157_s9  }
 0x352   :  { %3145 = dma.done.wait [#allocation4], 256  }
 0x353   :  { %3146 = vsyncadd [#allocation4], 4294967040 }
 0x354   :  { %1880 = vsyncpa [#allocation3], 1 }
 0x355   :  { %1881 = vsyncpa [#allocation7], 1 }
 0x356   :  { %1882 = vsyncpa [#allocation10], 1 }
 0x357   :  { %1883 = vsyncpa [#allocation14], 1 }
 0x358   :  { %1884 = vsyncpa [#allocation17], 1 }
 0x359   :  { %1885 = vsyncpa [#allocation4], 1 }
 0x35a   :  { %1886 = vsyncpa [#allocation5], 1 }

</bundles_post_ra>
